<compile_context>
chip_gen: v7x
topology: tpu7x:2x2x1
jax: 0.10.0
libtpu: 0.0.40
codegen_flags: <defaults>
</compile_context>

<pallas_src>
import functools

import jax
import jax.numpy as jnp
from jax import lax
from jax.experimental import pallas as pl
from jax.experimental.pallas import tpu as pltpu


def _round_up(x, m):
    return (x + m - 1) // m * m


# ---------------------------------------------------------------------------
# Pallas kernel: one time-chunk = batched input projection (MXU) + serial
# LSTM recurrence (registers) + batched vocab projection (MXU).
# ---------------------------------------------------------------------------
def lstm_fc_kernel(embed_ref,    # (Tc*Bp, Ep)  bf16  embedded tokens (time-major, flattened)
                   h0_ref,       # (Bp, Hp)     f32
                   c0_ref,       # (Bp, Hp)     f32
                   w_ih_ref,     # (Ep, 4Hp)    bf16  W_ih^T, gate order i,f,g,o (each Hp-wide)
                   w_hh_ref,     # (Hp, 4Hp)    bf16  W_hh^T
                   b_ref,        # (1, 4Hp)     f32   b_ih + b_hh (gate-padded)
                   w_fc_ref,     # (Hp, Vp)     bf16  W_fc^T
                   b_fc_ref,     # (1, Vp)      f32
                   out_ref,      # (Tc*Bp, Vp)  f32   logits chunk (pipelined)
                   hN_ref,       # (Bp, Hp)     f32   hidden state (resident across chunks)
                   cN_ref,       # (Bp, Hp)     f32   cell state   (resident across chunks)
                   xproj_scr,    # scratch (Tc*Bp, 4Hp) f32  precomputed x@W_ih + b
                   h_all_scr):   # scratch (Tc*Bp, Hp)  f32  hidden states of the chunk
    TB, Ep = embed_ref.shape
    Bp, Hp = h0_ref.shape
    Tc = TB // Bp

    # Initialize the cross-chunk state once.  The resident output blocks act
    # as the carried state (constant index_map => stays in VMEM across grid).
    @pl.when(pl.program_id(0) == 0)
    def _():
        hN_ref[...] = h0_ref[...]
        cN_ref[...] = c0_ref[...]

    # --- Phase 1: batched input projection for the whole chunk (one big
    #     bf16 MXU matmul, M = Tc*Bp) + gate bias, hoisted out of the loop.
    bias = b_ref[...]                                         # (1, 4Hp) f32, hoisted
    xproj_scr[...] = jnp.dot(embed_ref[...], w_ih_ref[...],
                             preferred_element_type=jnp.float32) + bias

    # --- Phase 2: serial recurrence; h/c live in registers (loop carry).
    w_hh = w_hh_ref[...]                                      # hoisted weight load

    def step(t, carry):
        h, c = carry
        off = pl.multiple_of(t * Bp, Bp)                      # sublane-aligned row offset
        gates = xproj_scr[pl.ds(off, Bp), :] + jnp.dot(
            h.astype(jnp.bfloat16), w_hh, preferred_element_type=jnp.float32)
        # PyTorch gate order: input, forget, cell(g), output; Hp-aligned blocks.
        i_g = jax.nn.sigmoid(gates[:, 0 * Hp:1 * Hp])
        f_g = jax.nn.sigmoid(gates[:, 1 * Hp:2 * Hp])
        g_g = jnp.tanh(gates[:, 2 * Hp:3 * Hp])
        o_g = jax.nn.sigmoid(gates[:, 3 * Hp:4 * Hp])
        c_new = f_g * c + i_g * g_g
        h_new = o_g * jnp.tanh(c_new)
        h_all_scr[pl.ds(off, Bp), :] = h_new
        return (h_new, c_new)

    hN, cN = lax.fori_loop(0, Tc, step, (hN_ref[...], cN_ref[...]),
                           unroll=min(Tc, 8))
    hN_ref[...] = hN
    cN_ref[...] = cN

    # --- Phase 3: batched vocab projection for the whole chunk (one big
    #     bf16 MXU matmul) instead of a per-timestep (B,H)x(H,V) matmul.
    logits = jnp.dot(h_all_scr[...].astype(jnp.bfloat16), w_fc_ref[...],
                     preferred_element_type=jnp.float32)
    out_ref[...] = (logits + b_fc_ref[...]).astype(out_ref.dtype)


# ---------------------------------------------------------------------------
# Time-chunk selection: largest divisor of T whose working set fits the VMEM
# budget (chosen to fit v7x's 64 MiB physical VMEM with headroom; v5e/v6e have
# 128 MiB physical, and the limit is raised explicitly via CompilerParams).
# ---------------------------------------------------------------------------
_VMEM_BUDGET = 32 * 1024 * 1024


def _pick_time_chunk(T, Bp, Ep, Hp, Vp):
    weights = 2 * (Ep * 4 * Hp + Hp * 4 * Hp + Hp * Vp)      # bf16 weights
    weights += 4 * (4 * Hp + Vp)                             # f32 biases
    weights += 4 * 4 * Bp * Hp                               # state in/out blocks

    def chunk_bytes(Tc):
        emb_in = 2 * Tc * Bp * Ep * 2                        # double-buffered bf16 in
        logits_out = 2 * Tc * Bp * Vp * 4                    # double-buffered f32 out
        scratch = Tc * Bp * 4 * Hp * 4 + Tc * Bp * Hp * 4    # xproj + h_all
        return emb_in + logits_out + scratch

    for Tc in range(min(T, 256), 0, -1):
        if T % Tc == 0 and weights + chunk_bytes(Tc) <= _VMEM_BUDGET:
            return Tc
    return 1


# ---------------------------------------------------------------------------
# Parameter packing: pad to lane/sublane-friendly shapes, cast matmul weights
# to bf16 (biases/state stay f32). Padded rows/cols are zero => inert.
# ---------------------------------------------------------------------------
def pack_params(params):
    emb = params["embedding"]          # (V, E) f32 (PAD row zero)
    w_ih_t = params["w_ih_t"]          # (E, 4H)
    w_hh_t = params["w_hh_t"]          # (H, 4H)
    b_g = params["b_gates"]            # (1, 4H)
    w_fc_t = params["w_fc_t"]          # (H, V)
    b_fc = params["b_fc"]              # (1, V)

    V, E = emb.shape
    H = w_hh_t.shape[0]
    Ep, Hp, Vp = _round_up(E, 128), _round_up(H, 128), _round_up(V, 128)

    def pad_gate_cols(w, rows_p):      # (rows, 4H) -> (rows_p, 4Hp), per-gate blocks
        rows = w.shape[0]
        out = jnp.zeros((rows_p, 4 * Hp), jnp.float32)
        for k in range(4):
            out = out.at[:rows, k * Hp:k * Hp + H].set(w[:, k * H:(k + 1) * H])
        return out

    packed = {
        "emb": jnp.zeros((V, Ep), jnp.float32).at[:, :E].set(emb).astype(jnp.bfloat16),
        "w_ih": pad_gate_cols(w_ih_t, Ep).astype(jnp.bfloat16),
        "w_hh": pad_gate_cols(w_hh_t, Hp).astype(jnp.bfloat16),
        "b_g": pad_gate_cols(b_g, 1),                                   # f32
        "w_fc": jnp.zeros((Hp, Vp), jnp.float32).at[:H, :V].set(w_fc_t).astype(jnp.bfloat16),
        "b_fc": jnp.zeros((1, Vp), jnp.float32).at[:, :V].set(b_fc),    # f32
    }
    dims = dict(V=V, E=E, H=H, Vp=Vp, Ep=Ep, Hp=Hp)
    return packed, dims


# ---------------------------------------------------------------------------
# Wrapper: embedding gather (glue) + pallas_call (grid over time chunks).
# ---------------------------------------------------------------------------
def text_model_forward(tokens, prev_state, packed, dims):
    """tokens: (B,T) int32; prev_state: ((1,B,H),(1,B,H)); returns (out, state)."""
    V, E, H = dims["V"], dims["E"], dims["H"]
    Vp, Ep, Hp = dims["Vp"], dims["Ep"], dims["Hp"]
    B, T = tokens.shape
    Bp = _round_up(B, 8)

    # Embedding gather directly in time-major order (no extra HBM transpose
    # of the big embedded tensor). TODO(synk): gather stays in XLA glue — a
    # data-dependent HBM gather has no clean rectangular BlockSpec equivalent.
    embed_tm = jnp.take(packed["emb"], tokens.T, axis=0)       # (T, B, Ep) bf16
    if Bp != B:
        embed_tm = jnp.pad(embed_tm, ((0, 0), (0, Bp - B), (0, 0)))
    embed_flat = embed_tm.reshape(T * Bp, Ep)                  # contiguous reshape

    h0 = prev_state[0][0]                                      # (B, H)
    c0 = prev_state[1][0]
    h0p = jnp.zeros((Bp, Hp), jnp.float32).at[:B, :H].set(h0)
    c0p = jnp.zeros((Bp, Hp), jnp.float32).at[:B, :H].set(c0)

    Tc = _pick_time_chunk(T, Bp, Ep, Hp, Vp)
    grid = (T // Tc,)
    const2 = lambda t: (0, 0)

    out_flat, hN, cN = pl.pallas_call(
        lstm_fc_kernel,
        grid=grid,
        in_specs=[
            pl.BlockSpec((Tc * Bp, Ep), lambda t: (t, 0)),     # embed chunk (pipelined)
            pl.BlockSpec((Bp, Hp), const2),                    # h0
            pl.BlockSpec((Bp, Hp), const2),                    # c0
            pl.BlockSpec((Ep, 4 * Hp), const2),                # W_ih^T (resident)
            pl.BlockSpec((Hp, 4 * Hp), const2),                # W_hh^T (resident)
            pl.BlockSpec((1, 4 * Hp), const2),                 # gate bias
            pl.BlockSpec((Hp, Vp), const2),                    # W_fc^T (resident)
            pl.BlockSpec((1, Vp), const2),                     # fc bias
        ],
        out_specs=(
            pl.BlockSpec((Tc * Bp, Vp), lambda t: (t, 0)),     # logits chunk (pipelined)
            pl.BlockSpec((Bp, Hp), const2),                    # hN (resident carrier)
            pl.BlockSpec((Bp, Hp), const2),                    # cN (resident carrier)
        ),
        out_shape=(
            jax.ShapeDtypeStruct((T * Bp, Vp), jnp.float32),
            jax.ShapeDtypeStruct((Bp, Hp), jnp.float32),
            jax.ShapeDtypeStruct((Bp, Hp), jnp.float32),
        ),
        scratch_shapes=[
            pltpu.VMEM((Tc * Bp, 4 * Hp), jnp.float32),        # x @ W_ih + b for the chunk
            pltpu.VMEM((Tc * Bp, Hp), jnp.float32),            # hidden states of the chunk
        ],
        compiler_params=pltpu.CompilerParams(
            dimension_semantics=("arbitrary",),                # sequential over time chunks
            vmem_limit_bytes=48 * 1024 * 1024,
        ),
    )(embed_flat, h0p, c0p, packed["w_ih"], packed["w_hh"], packed["b_g"],
      packed["w_fc"], packed["b_fc"])

    out_tm = out_flat.reshape(T, Bp, Vp)[:, :B, :V]            # strip padding
    out = jnp.transpose(out_tm, (1, 0, 2))                     # (B, T, V) batch-first
    state = (hN[:B, :H][None, ...], cN[:B, :H][None, ...])     # (1, B, H) each
    return out, state


# ---------------------------------------------------------------------------
# Pure-JAX f32 reference (mirrors torch.nn.LSTM / nn.Linear semantics).
# ---------------------------------------------------------------------------
def reference_forward(tokens, prev_state, params):
    embed = jnp.take(params["embedding"], tokens, axis=0)      # (B, T, E)
    H = prev_state[0].shape[-1]

    def step(carry, x_t):
        h, c = carry
        gates = x_t @ params["w_ih_t"] + h @ params["w_hh_t"] + params["b_gates"]
        i_g = jax.nn.sigmoid(gates[:, 0 * H:1 * H])
        f_g = jax.nn.sigmoid(gates[:, 1 * H:2 * H])
        g_g = jnp.tanh(gates[:, 2 * H:3 * H])
        o_g = jax.nn.sigmoid(gates[:, 3 * H:4 * H])
        c_new = f_g * c + i_g * g_g
        h_new = o_g * jnp.tanh(c_new)
        return (h_new, c_new), h_new

    (hN, cN), hs = lax.scan(step, (prev_state[0][0], prev_state[1][0]),
                            jnp.transpose(embed, (1, 0, 2)))
    out = jnp.transpose(hs, (1, 0, 2)) @ params["w_fc_t"] + params["b_fc"]
    return out, (hN[None], cN[None])


# ---------------------------------------------------------------------------
# Deterministic parameter construction (shapes from TextModel.__init__).
# ---------------------------------------------------------------------------
def make_params(key, vocab_size, emb_dim, hidden_size, pad_idx=0):
    ks = jax.random.split(key, 7)
    bound = 1.0 / jnp.sqrt(hidden_size)
    emb = jax.random.normal(ks[0], (vocab_size, emb_dim), jnp.float32)
    emb = emb.at[pad_idx].set(0.0)                             # padding_idx row zero
    w_ih = jax.random.uniform(ks[1], (4 * hidden_size, emb_dim), jnp.float32, -bound, bound)
    w_hh = jax.random.uniform(ks[2], (4 * hidden_size, hidden_size), jnp.float32, -bound, bound)
    b_ih = jax.random.uniform(ks[3], (4 * hidden_size,), jnp.float32, -bound, bound)
    b_hh = jax.random.uniform(ks[4], (4 * hidden_size,), jnp.float32, -bound, bound)
    w_fc = jax.random.uniform(ks[5], (vocab_size, hidden_size), jnp.float32, -bound, bound)
    b_fc = jax.random.uniform(ks[6], (vocab_size,), jnp.float32, -bound, bound)
    return {
        "embedding": emb,
        "w_ih_t": w_ih.T,                                      # (E, 4H)
        "w_hh_t": w_hh.T,                                      # (H, 4H)
        "b_gates": (b_ih + b_hh)[None, :],                     # (1, 4H)
        "w_fc_t": w_fc.T,                                      # (H, V)
        "b_fc": b_fc[None, :],                                 # (1, V)
    }


if __name__ == "__main__":
    # Small shapes consistent with the module (scaled down from 1024/150).
    B, T = 2, 8
    VOCAB, EMB, HIDDEN = 32, 16, 32

    key = jax.random.PRNGKey(0)
    k_par, k_tok = jax.random.split(key)
    params = make_params(k_par, VOCAB, EMB, HIDDEN, pad_idx=0)
    packed, dims = pack_params(params)

    tokens = jax.random.randint(k_tok, (B, T), 0, VOCAB, dtype=jnp.int32)
    # init_state(): zeros of shape (n_layers=1, B, H)
    prev_state = (jnp.zeros((1, B, HIDDEN), jnp.float32),
                  jnp.zeros((1, B, HIDDEN), jnp.float32))

    fwd = jax.jit(functools.partial(text_model_forward, dims=dims))
    out, (hN, cN) = fwd(tokens, prev_state, packed)
    jax.block_until_ready(out)

    ref_out, (ref_h, ref_c) = reference_forward(tokens, prev_state, params)
    assert out.shape == (B, T, VOCAB)
    assert hN.shape == (1, B, HIDDEN) and cN.shape == (1, B, HIDDEN)
    # bf16 matmul operands (f32 accumulation) => loose-but-meaningful tolerance.
    assert jnp.allclose(out, ref_out, atol=2e-2, rtol=2e-2)
    assert jnp.allclose(hN, ref_h, atol=2e-2, rtol=2e-2)
    assert jnp.allclose(cN, ref_c, atol=2e-2, rtol=2e-2)

    print("KERNEL_OK")
</pallas_src>

<mosaic_0001>
module attributes {stable_mosaic.version = 11 : i64} {
  func.func @lstm_fc_kernel(%arg0: i32, %arg1: memref<64x128xbf16, #tpu.memory_space<vmem>>, %arg2: memref<8x128xf32, #tpu.memory_space<vmem>>, %arg3: memref<8x128xf32, #tpu.memory_space<vmem>>, %arg4: memref<128x512xbf16, #tpu.memory_space<vmem>>, %arg5: memref<128x512xbf16, #tpu.memory_space<vmem>>, %arg6: memref<1x512xf32, #tpu.memory_space<vmem>>, %arg7: memref<128x128xbf16, #tpu.memory_space<vmem>>, %arg8: memref<1x128xf32, #tpu.memory_space<vmem>>, %arg9: memref<64x128xf32, #tpu.memory_space<vmem>>, %arg10: memref<8x128xf32, #tpu.memory_space<vmem>>, %arg11: memref<8x128xf32, #tpu.memory_space<vmem>>, %arg12: memref<64x512xf32, #tpu.memory_space<vmem>>, %arg13: memref<64x128xf32, #tpu.memory_space<vmem>>) attributes {dimension_semantics = [#tpu.dimension_semantics<arbitrary>], iteration_bounds = array<i64: 1>, scalar_prefetch = 0 : i64, scratch_operands = 2 : i64, tpu.core_type = #tpu.core_type<tc>, window_params = [{transform_indices = @transform_0, window_bounds = array<i64: 64, 128>}, {pipeline_mode = #tpu.pipeline_mode<synchronous>, transform_indices = @transform_1, window_bounds = array<i64: 8, 128>}, {pipeline_mode = #tpu.pipeline_mode<synchronous>, transform_indices = @transform_2, window_bounds = array<i64: 8, 128>}, {pipeline_mode = #tpu.pipeline_mode<synchronous>, transform_indices = @transform_3, window_bounds = array<i64: 128, 512>}, {pipeline_mode = #tpu.pipeline_mode<synchronous>, transform_indices = @transform_4, window_bounds = array<i64: 128, 512>}, {pipeline_mode = #tpu.pipeline_mode<synchronous>, transform_indices = @transform_5, window_bounds = array<i64: 1, 512>}, {pipeline_mode = #tpu.pipeline_mode<synchronous>, transform_indices = @transform_6, window_bounds = array<i64: 128, 128>}, {pipeline_mode = #tpu.pipeline_mode<synchronous>, transform_indices = @transform_7, window_bounds = array<i64: 1, 128>}, {transform_indices = @transform_8, window_bounds = array<i64: 64, 128>}, {pipeline_mode = #tpu.pipeline_mode<synchronous>, transform_indices = @transform_9, window_bounds = array<i64: 8, 128>}, {pipeline_mode = #tpu.pipeline_mode<synchronous>, transform_indices = @transform_10, window_bounds = array<i64: 8, 128>}]} {
    %c0_i32 = arith.constant 0 : i32
    %0 = arith.cmpi eq, %arg0, %c0_i32 : i32
    %1 = arith.extui %0 : i1 to i32
    %c0_i32_0 = arith.constant 0 : i32
    %2 = arith.cmpi ne, %1, %c0_i32_0 : i32
    scf.if %2 {
      %c0_84 = arith.constant 0 : index
      %c0_85 = arith.constant 0 : index
      %295 = vector.load %arg2[%c0_84, %c0_85] : memref<8x128xf32, #tpu.memory_space<vmem>>, vector<8x128xf32>
      %c0_86 = arith.constant 0 : index
      %c0_87 = arith.constant 0 : index
      %296 = vector.load %arg10[%c0_86, %c0_87] : memref<8x128xf32, #tpu.memory_space<vmem>>, vector<8x128xf32>
      tpu.vector_store %arg10[%c0_86, %c0_87], %295 {strides = array<i32>} : memref<8x128xf32, #tpu.memory_space<vmem>>, vector<8x128xf32>,
      %c0_88 = arith.constant 0 : index
      %c0_89 = arith.constant 0 : index
      %297 = vector.load %arg3[%c0_88, %c0_89] : memref<8x128xf32, #tpu.memory_space<vmem>>, vector<8x128xf32>
      %c0_90 = arith.constant 0 : index
      %c0_91 = arith.constant 0 : index
      %298 = vector.load %arg11[%c0_90, %c0_91] : memref<8x128xf32, #tpu.memory_space<vmem>>, vector<8x128xf32>
      tpu.vector_store %arg11[%c0_90, %c0_91], %297 {strides = array<i32>} : memref<8x128xf32, #tpu.memory_space<vmem>>, vector<8x128xf32>,
    } else {
    }
    %c0 = arith.constant 0 : index
    %c0_1 = arith.constant 0 : index
    %3 = vector.load %arg6[%c0, %c0_1] : memref<1x512xf32, #tpu.memory_space<vmem>>, vector<1x512xf32>
    %c0_2 = arith.constant 0 : index
    %c0_3 = arith.constant 0 : index
    %4 = vector.load %arg1[%c0_2, %c0_3] : memref<64x128xbf16, #tpu.memory_space<vmem>>, vector<64x128xbf16>
    %c0_4 = arith.constant 0 : index
    %c0_5 = arith.constant 0 : index
    %5 = vector.load %arg4[%c0_4, %c0_5] : memref<128x512xbf16, #tpu.memory_space<vmem>>, vector<128x512xbf16>
    %cst = arith.constant dense<0.000000e+00> : vector<64x512xf32>
    %6 = tpu.matmul %4, %5, %cst {dimension_numbers = #tpu.dot_dimension_numbers<[1], [0], [0], [1], [0, 0, 1, 1], [], []>} : vector<64x128xbf16>, vector<128x512xbf16>, vector<64x512xf32> -> vector<64x512xf32>
    %7 = vector.broadcast %3 : vector<1x512xf32> to vector<64x512xf32>
    %8 = arith.addf %6, %7 : vector<64x512xf32>
    %c0_6 = arith.constant 0 : index
    %c0_7 = arith.constant 0 : index
    %9 = vector.load %arg12[%c0_6, %c0_7] : memref<64x512xf32, #tpu.memory_space<vmem>>, vector<64x512xf32>
    tpu.vector_store %arg12[%c0_6, %c0_7], %8 {strides = array<i32>} : memref<64x512xf32, #tpu.memory_space<vmem>>, vector<64x512xf32>,
    %c0_8 = arith.constant 0 : index
    %c0_9 = arith.constant 0 : index
    %10 = vector.load %arg5[%c0_8, %c0_9] : memref<128x512xbf16, #tpu.memory_space<vmem>>, vector<128x512xbf16>
    %c0_10 = arith.constant 0 : index
    %c0_11 = arith.constant 0 : index
    %11 = vector.load %arg10[%c0_10, %c0_11] : memref<8x128xf32, #tpu.memory_space<vmem>>, vector<8x128xf32>
    %c0_12 = arith.constant 0 : index
    %c0_13 = arith.constant 0 : index
    %12 = vector.load %arg11[%c0_12, %c0_13] : memref<8x128xf32, #tpu.memory_space<vmem>>, vector<8x128xf32>
    %c0_i32_14 = arith.constant 0 : i32
    %c8_i32 = arith.constant 8 : i32
    %13 = arith.muli %c0_i32_14, %c8_i32 : i32
    %14 = tpu.assume_multiple %13, 8 : i32
    %15 = arith.index_cast %14 : i32 to index
    %c0_15 = arith.constant 0 : index
    %16 = vector.load %arg12[%15, %c0_15] : memref<64x512xf32, #tpu.memory_space<vmem>>, vector<8x512xf32>
    %17 = arith.truncf %11 : vector<8x128xf32> to vector<8x128xbf16>
    %cst_16 = arith.constant dense<0.000000e+00> : vector<8x512xf32>
    %18 = tpu.matmul %17, %10, %cst_16 {dimension_numbers = #tpu.dot_dimension_numbers<[1], [0], [0], [1], [0, 0, 1, 1], [], []>} : vector<8x128xbf16>, vector<128x512xbf16>, vector<8x512xf32> -> vector<8x512xf32>
    %19 = arith.addf %16, %18 : vector<8x512xf32>
    %20 = vector.extract_strided_slice %19 {offsets = [0, 0], sizes = [8, 128], strides = [1, 1]} : vector<8x512xf32> to vector<8x128xf32>
    %21 = arith.negf %20 : vector<8x128xf32>
    %22 = math.exp %21 : vector<8x128xf32>
    %cst_17 = arith.constant 1.000000e+00 : f32
    %23 = vector.broadcast %cst_17 : f32 to vector<8x128xf32>
    %24 = arith.addf %23, %22 : vector<8x128xf32>
    %25 = arith.divf %23, %24 : vector<8x128xf32>
    %26 = vector.extract_strided_slice %19 {offsets = [0, 128], sizes = [8, 128], strides = [1, 1]} : vector<8x512xf32> to vector<8x128xf32>
    %27 = arith.negf %26 : vector<8x128xf32>
    %28 = math.exp %27 : vector<8x128xf32>
    %cst_18 = arith.constant 1.000000e+00 : f32
    %29 = vector.broadcast %cst_18 : f32 to vector<8x128xf32>
    %30 = arith.addf %29, %28 : vector<8x128xf32>
    %31 = arith.divf %29, %30 : vector<8x128xf32>
    %32 = vector.extract_strided_slice %19 {offsets = [0, 256], sizes = [8, 128], strides = [1, 1]} : vector<8x512xf32> to vector<8x128xf32>
    %33 = math.tanh %32 : vector<8x128xf32>
    %34 = vector.extract_strided_slice %19 {offsets = [0, 384], sizes = [8, 128], strides = [1, 1]} : vector<8x512xf32> to vector<8x128xf32>
    %35 = arith.negf %34 : vector<8x128xf32>
    %36 = math.exp %35 : vector<8x128xf32>
    %cst_19 = arith.constant 1.000000e+00 : f32
    %37 = vector.broadcast %cst_19 : f32 to vector<8x128xf32>
    %38 = arith.addf %37, %36 : vector<8x128xf32>
    %39 = arith.divf %37, %38 : vector<8x128xf32>
    %40 = arith.mulf %31, %12 : vector<8x128xf32>
    %41 = arith.mulf %25, %33 : vector<8x128xf32>
    %42 = arith.addf %40, %41 : vector<8x128xf32>
    %43 = math.tanh %42 : vector<8x128xf32>
    %44 = arith.mulf %39, %43 : vector<8x128xf32>
    %45 = arith.index_cast %14 : i32 to index
    %c0_20 = arith.constant 0 : index
    %46 = vector.load %arg13[%45, %c0_20] : memref<64x128xf32, #tpu.memory_space<vmem>>, vector<8x128xf32>
    tpu.vector_store %arg13[%45, %c0_20], %44 {strides = array<i32>} : memref<64x128xf32, #tpu.memory_space<vmem>>, vector<8x128xf32>,
    %c1_i32 = arith.constant 1 : i32
    %c8_i32_21 = arith.constant 8 : i32
    %47 = arith.muli %c1_i32, %c8_i32_21 : i32
    %48 = tpu.assume_multiple %47, 8 : i32
    %49 = arith.index_cast %48 : i32 to index
    %c0_22 = arith.constant 0 : index
    %50 = vector.load %arg12[%49, %c0_22] : memref<64x512xf32, #tpu.memory_space<vmem>>, vector<8x512xf32>
    %51 = arith.truncf %44 : vector<8x128xf32> to vector<8x128xbf16>
    %cst_23 = arith.constant dense<0.000000e+00> : vector<8x512xf32>
    %52 = tpu.matmul %51, %10, %cst_23 {dimension_numbers = #tpu.dot_dimension_numbers<[1], [0], [0], [1], [0, 0, 1, 1], [], []>} : vector<8x128xbf16>, vector<128x512xbf16>, vector<8x512xf32> -> vector<8x512xf32>
    %53 = arith.addf %50, %52 : vector<8x512xf32>
    %54 = vector.extract_strided_slice %53 {offsets = [0, 0], sizes = [8, 128], strides = [1, 1]} : vector<8x512xf32> to vector<8x128xf32>
    %55 = arith.negf %54 : vector<8x128xf32>
    %56 = math.exp %55 : vector<8x128xf32>
    %cst_24 = arith.constant 1.000000e+00 : f32
    %57 = vector.broadcast %cst_24 : f32 to vector<8x128xf32>
    %58 = arith.addf %57, %56 : vector<8x128xf32>
    %59 = arith.divf %57, %58 : vector<8x128xf32>
    %60 = vector.extract_strided_slice %53 {offsets = [0, 128], sizes = [8, 128], strides = [1, 1]} : vector<8x512xf32> to vector<8x128xf32>
    %61 = arith.negf %60 : vector<8x128xf32>
    %62 = math.exp %61 : vector<8x128xf32>
    %cst_25 = arith.constant 1.000000e+00 : f32
    %63 = vector.broadcast %cst_25 : f32 to vector<8x128xf32>
    %64 = arith.addf %63, %62 : vector<8x128xf32>
    %65 = arith.divf %63, %64 : vector<8x128xf32>
    %66 = vector.extract_strided_slice %53 {offsets = [0, 256], sizes = [8, 128], strides = [1, 1]} : vector<8x512xf32> to vector<8x128xf32>
    %67 = math.tanh %66 : vector<8x128xf32>
    %68 = vector.extract_strided_slice %53 {offsets = [0, 384], sizes = [8, 128], strides = [1, 1]} : vector<8x512xf32> to vector<8x128xf32>
    %69 = arith.negf %68 : vector<8x128xf32>
    %70 = math.exp %69 : vector<8x128xf32>
    %cst_26 = arith.constant 1.000000e+00 : f32
    %71 = vector.broadcast %cst_26 : f32 to vector<8x128xf32>
    %72 = arith.addf %71, %70 : vector<8x128xf32>
    %73 = arith.divf %71, %72 : vector<8x128xf32>
    %74 = arith.mulf %65, %42 : vector<8x128xf32>
    %75 = arith.mulf %59, %67 : vector<8x128xf32>
    %76 = arith.addf %74, %75 : vector<8x128xf32>
    %77 = math.tanh %76 : vector<8x128xf32>
    %78 = arith.mulf %73, %77 : vector<8x128xf32>
    %79 = arith.index_cast %48 : i32 to index
    %c0_27 = arith.constant 0 : index
    %80 = vector.load %arg13[%79, %c0_27] : memref<64x128xf32, #tpu.memory_space<vmem>>, vector<8x128xf32>
    tpu.vector_store %arg13[%79, %c0_27], %78 {strides = array<i32>} : memref<64x128xf32, #tpu.memory_space<vmem>>, vector<8x128xf32>,
    %c2_i32 = arith.constant 2 : i32
    %c8_i32_28 = arith.constant 8 : i32
    %81 = arith.muli %c2_i32, %c8_i32_28 : i32
    %82 = tpu.assume_multiple %81, 8 : i32
    %83 = arith.index_cast %82 : i32 to index
    %c0_29 = arith.constant 0 : index
    %84 = vector.load %arg12[%83, %c0_29] : memref<64x512xf32, #tpu.memory_space<vmem>>, vector<8x512xf32>
    %85 = arith.truncf %78 : vector<8x128xf32> to vector<8x128xbf16>
    %cst_30 = arith.constant dense<0.000000e+00> : vector<8x512xf32>
    %86 = tpu.matmul %85, %10, %cst_30 {dimension_numbers = #tpu.dot_dimension_numbers<[1], [0], [0], [1], [0, 0, 1, 1], [], []>} : vector<8x128xbf16>, vector<128x512xbf16>, vector<8x512xf32> -> vector<8x512xf32>
    %87 = arith.addf %84, %86 : vector<8x512xf32>
    %88 = vector.extract_strided_slice %87 {offsets = [0, 0], sizes = [8, 128], strides = [1, 1]} : vector<8x512xf32> to vector<8x128xf32>
    %89 = arith.negf %88 : vector<8x128xf32>
    %90 = math.exp %89 : vector<8x128xf32>
    %cst_31 = arith.constant 1.000000e+00 : f32
    %91 = vector.broadcast %cst_31 : f32 to vector<8x128xf32>
    %92 = arith.addf %91, %90 : vector<8x128xf32>
    %93 = arith.divf %91, %92 : vector<8x128xf32>
    %94 = vector.extract_strided_slice %87 {offsets = [0, 128], sizes = [8, 128], strides = [1, 1]} : vector<8x512xf32> to vector<8x128xf32>
    %95 = arith.negf %94 : vector<8x128xf32>
    %96 = math.exp %95 : vector<8x128xf32>
    %cst_32 = arith.constant 1.000000e+00 : f32
    %97 = vector.broadcast %cst_32 : f32 to vector<8x128xf32>
    %98 = arith.addf %97, %96 : vector<8x128xf32>
    %99 = arith.divf %97, %98 : vector<8x128xf32>
    %100 = vector.extract_strided_slice %87 {offsets = [0, 256], sizes = [8, 128], strides = [1, 1]} : vector<8x512xf32> to vector<8x128xf32>
    %101 = math.tanh %100 : vector<8x128xf32>
    %102 = vector.extract_strided_slice %87 {offsets = [0, 384], sizes = [8, 128], strides = [1, 1]} : vector<8x512xf32> to vector<8x128xf32>
    %103 = arith.negf %102 : vector<8x128xf32>
    %104 = math.exp %103 : vector<8x128xf32>
    %cst_33 = arith.constant 1.000000e+00 : f32
    %105 = vector.broadcast %cst_33 : f32 to vector<8x128xf32>
    %106 = arith.addf %105, %104 : vector<8x128xf32>
    %107 = arith.divf %105, %106 : vector<8x128xf32>
    %108 = arith.mulf %99, %76 : vector<8x128xf32>
    %109 = arith.mulf %93, %101 : vector<8x128xf32>
    %110 = arith.addf %108, %109 : vector<8x128xf32>
    %111 = math.tanh %110 : vector<8x128xf32>
    %112 = arith.mulf %107, %111 : vector<8x128xf32>
    %113 = arith.index_cast %82 : i32 to index
    %c0_34 = arith.constant 0 : index
    %114 = vector.load %arg13[%113, %c0_34] : memref<64x128xf32, #tpu.memory_space<vmem>>, vector<8x128xf32>
    tpu.vector_store %arg13[%113, %c0_34], %112 {strides = array<i32>} : memref<64x128xf32, #tpu.memory_space<vmem>>, vector<8x128xf32>,
    %c3_i32 = arith.constant 3 : i32
    %c8_i32_35 = arith.constant 8 : i32
    %115 = arith.muli %c3_i32, %c8_i32_35 : i32
    %116 = tpu.assume_multiple %115, 8 : i32
    %117 = arith.index_cast %116 : i32 to index
    %c0_36 = arith.constant 0 : index
    %118 = vector.load %arg12[%117, %c0_36] : memref<64x512xf32, #tpu.memory_space<vmem>>, vector<8x512xf32>
    %119 = arith.truncf %112 : vector<8x128xf32> to vector<8x128xbf16>
    %cst_37 = arith.constant dense<0.000000e+00> : vector<8x512xf32>
    %120 = tpu.matmul %119, %10, %cst_37 {dimension_numbers = #tpu.dot_dimension_numbers<[1], [0], [0], [1], [0, 0, 1, 1], [], []>} : vector<8x128xbf16>, vector<128x512xbf16>, vector<8x512xf32> -> vector<8x512xf32>
    %121 = arith.addf %118, %120 : vector<8x512xf32>
    %122 = vector.extract_strided_slice %121 {offsets = [0, 0], sizes = [8, 128], strides = [1, 1]} : vector<8x512xf32> to vector<8x128xf32>
    %123 = arith.negf %122 : vector<8x128xf32>
    %124 = math.exp %123 : vector<8x128xf32>
    %cst_38 = arith.constant 1.000000e+00 : f32
    %125 = vector.broadcast %cst_38 : f32 to vector<8x128xf32>
    %126 = arith.addf %125, %124 : vector<8x128xf32>
    %127 = arith.divf %125, %126 : vector<8x128xf32>
    %128 = vector.extract_strided_slice %121 {offsets = [0, 128], sizes = [8, 128], strides = [1, 1]} : vector<8x512xf32> to vector<8x128xf32>
    %129 = arith.negf %128 : vector<8x128xf32>
    %130 = math.exp %129 : vector<8x128xf32>
    %cst_39 = arith.constant 1.000000e+00 : f32
    %131 = vector.broadcast %cst_39 : f32 to vector<8x128xf32>
    %132 = arith.addf %131, %130 : vector<8x128xf32>
    %133 = arith.divf %131, %132 : vector<8x128xf32>
    %134 = vector.extract_strided_slice %121 {offsets = [0, 256], sizes = [8, 128], strides = [1, 1]} : vector<8x512xf32> to vector<8x128xf32>
    %135 = math.tanh %134 : vector<8x128xf32>
    %136 = vector.extract_strided_slice %121 {offsets = [0, 384], sizes = [8, 128], strides = [1, 1]} : vector<8x512xf32> to vector<8x128xf32>
    %137 = arith.negf %136 : vector<8x128xf32>
    %138 = math.exp %137 : vector<8x128xf32>
    %cst_40 = arith.constant 1.000000e+00 : f32
    %139 = vector.broadcast %cst_40 : f32 to vector<8x128xf32>
    %140 = arith.addf %139, %138 : vector<8x128xf32>
    %141 = arith.divf %139, %140 : vector<8x128xf32>
    %142 = arith.mulf %133, %110 : vector<8x128xf32>
    %143 = arith.mulf %127, %135 : vector<8x128xf32>
    %144 = arith.addf %142, %143 : vector<8x128xf32>
    %145 = math.tanh %144 : vector<8x128xf32>
    %146 = arith.mulf %141, %145 : vector<8x128xf32>
    %147 = arith.index_cast %116 : i32 to index
    %c0_41 = arith.constant 0 : index
    %148 = vector.load %arg13[%147, %c0_41] : memref<64x128xf32, #tpu.memory_space<vmem>>, vector<8x128xf32>
    tpu.vector_store %arg13[%147, %c0_41], %146 {strides = array<i32>} : memref<64x128xf32, #tpu.memory_space<vmem>>, vector<8x128xf32>,
    %c4_i32 = arith.constant 4 : i32
    %c8_i32_42 = arith.constant 8 : i32
    %149 = arith.muli %c4_i32, %c8_i32_42 : i32
    %150 = tpu.assume_multiple %149, 8 : i32
    %151 = arith.index_cast %150 : i32 to index
    %c0_43 = arith.constant 0 : index
    %152 = vector.load %arg12[%151, %c0_43] : memref<64x512xf32, #tpu.memory_space<vmem>>, vector<8x512xf32>
    %153 = arith.truncf %146 : vector<8x128xf32> to vector<8x128xbf16>
    %cst_44 = arith.constant dense<0.000000e+00> : vector<8x512xf32>
    %154 = tpu.matmul %153, %10, %cst_44 {dimension_numbers = #tpu.dot_dimension_numbers<[1], [0], [0], [1], [0, 0, 1, 1], [], []>} : vector<8x128xbf16>, vector<128x512xbf16>, vector<8x512xf32> -> vector<8x512xf32>
    %155 = arith.addf %152, %154 : vector<8x512xf32>
    %156 = vector.extract_strided_slice %155 {offsets = [0, 0], sizes = [8, 128], strides = [1, 1]} : vector<8x512xf32> to vector<8x128xf32>
    %157 = arith.negf %156 : vector<8x128xf32>
    %158 = math.exp %157 : vector<8x128xf32>
    %cst_45 = arith.constant 1.000000e+00 : f32
    %159 = vector.broadcast %cst_45 : f32 to vector<8x128xf32>
    %160 = arith.addf %159, %158 : vector<8x128xf32>
    %161 = arith.divf %159, %160 : vector<8x128xf32>
    %162 = vector.extract_strided_slice %155 {offsets = [0, 128], sizes = [8, 128], strides = [1, 1]} : vector<8x512xf32> to vector<8x128xf32>
    %163 = arith.negf %162 : vector<8x128xf32>
    %164 = math.exp %163 : vector<8x128xf32>
    %cst_46 = arith.constant 1.000000e+00 : f32
    %165 = vector.broadcast %cst_46 : f32 to vector<8x128xf32>
    %166 = arith.addf %165, %164 : vector<8x128xf32>
    %167 = arith.divf %165, %166 : vector<8x128xf32>
    %168 = vector.extract_strided_slice %155 {offsets = [0, 256], sizes = [8, 128], strides = [1, 1]} : vector<8x512xf32> to vector<8x128xf32>
    %169 = math.tanh %168 : vector<8x128xf32>
    %170 = vector.extract_strided_slice %155 {offsets = [0, 384], sizes = [8, 128], strides = [1, 1]} : vector<8x512xf32> to vector<8x128xf32>
    %171 = arith.negf %170 : vector<8x128xf32>
    %172 = math.exp %171 : vector<8x128xf32>
    %cst_47 = arith.constant 1.000000e+00 : f32
    %173 = vector.broadcast %cst_47 : f32 to vector<8x128xf32>
    %174 = arith.addf %173, %172 : vector<8x128xf32>
    %175 = arith.divf %173, %174 : vector<8x128xf32>
    %176 = arith.mulf %167, %144 : vector<8x128xf32>
    %177 = arith.mulf %161, %169 : vector<8x128xf32>
    %178 = arith.addf %176, %177 : vector<8x128xf32>
    %179 = math.tanh %178 : vector<8x128xf32>
    %180 = arith.mulf %175, %179 : vector<8x128xf32>
    %181 = arith.index_cast %150 : i32 to index
    %c0_48 = arith.constant 0 : index
    %182 = vector.load %arg13[%181, %c0_48] : memref<64x128xf32, #tpu.memory_space<vmem>>, vector<8x128xf32>
    tpu.vector_store %arg13[%181, %c0_48], %180 {strides = array<i32>} : memref<64x128xf32, #tpu.memory_space<vmem>>, vector<8x128xf32>,
    %c5_i32 = arith.constant 5 : i32
    %c8_i32_49 = arith.constant 8 : i32
    %183 = arith.muli %c5_i32, %c8_i32_49 : i32
    %184 = tpu.assume_multiple %183, 8 : i32
    %185 = arith.index_cast %184 : i32 to index
    %c0_50 = arith.constant 0 : index
    %186 = vector.load %arg12[%185, %c0_50] : memref<64x512xf32, #tpu.memory_space<vmem>>, vector<8x512xf32>
    %187 = arith.truncf %180 : vector<8x128xf32> to vector<8x128xbf16>
    %cst_51 = arith.constant dense<0.000000e+00> : vector<8x512xf32>
    %188 = tpu.matmul %187, %10, %cst_51 {dimension_numbers = #tpu.dot_dimension_numbers<[1], [0], [0], [1], [0, 0, 1, 1], [], []>} : vector<8x128xbf16>, vector<128x512xbf16>, vector<8x512xf32> -> vector<8x512xf32>
    %189 = arith.addf %186, %188 : vector<8x512xf32>
    %190 = vector.extract_strided_slice %189 {offsets = [0, 0], sizes = [8, 128], strides = [1, 1]} : vector<8x512xf32> to vector<8x128xf32>
    %191 = arith.negf %190 : vector<8x128xf32>
    %192 = math.exp %191 : vector<8x128xf32>
    %cst_52 = arith.constant 1.000000e+00 : f32
    %193 = vector.broadcast %cst_52 : f32 to vector<8x128xf32>
    %194 = arith.addf %193, %192 : vector<8x128xf32>
    %195 = arith.divf %193, %194 : vector<8x128xf32>
    %196 = vector.extract_strided_slice %189 {offsets = [0, 128], sizes = [8, 128], strides = [1, 1]} : vector<8x512xf32> to vector<8x128xf32>
    %197 = arith.negf %196 : vector<8x128xf32>
    %198 = math.exp %197 : vector<8x128xf32>
    %cst_53 = arith.constant 1.000000e+00 : f32
    %199 = vector.broadcast %cst_53 : f32 to vector<8x128xf32>
    %200 = arith.addf %199, %198 : vector<8x128xf32>
    %201 = arith.divf %199, %200 : vector<8x128xf32>
    %202 = vector.extract_strided_slice %189 {offsets = [0, 256], sizes = [8, 128], strides = [1, 1]} : vector<8x512xf32> to vector<8x128xf32>
    %203 = math.tanh %202 : vector<8x128xf32>
    %204 = vector.extract_strided_slice %189 {offsets = [0, 384], sizes = [8, 128], strides = [1, 1]} : vector<8x512xf32> to vector<8x128xf32>
    %205 = arith.negf %204 : vector<8x128xf32>
    %206 = math.exp %205 : vector<8x128xf32>
    %cst_54 = arith.constant 1.000000e+00 : f32
    %207 = vector.broadcast %cst_54 : f32 to vector<8x128xf32>
    %208 = arith.addf %207, %206 : vector<8x128xf32>
    %209 = arith.divf %207, %208 : vector<8x128xf32>
    %210 = arith.mulf %201, %178 : vector<8x128xf32>
    %211 = arith.mulf %195, %203 : vector<8x128xf32>
    %212 = arith.addf %210, %211 : vector<8x128xf32>
    %213 = math.tanh %212 : vector<8x128xf32>
    %214 = arith.mulf %209, %213 : vector<8x128xf32>
    %215 = arith.index_cast %184 : i32 to index
    %c0_55 = arith.constant 0 : index
    %216 = vector.load %arg13[%215, %c0_55] : memref<64x128xf32, #tpu.memory_space<vmem>>, vector<8x128xf32>
    tpu.vector_store %arg13[%215, %c0_55], %214 {strides = array<i32>} : memref<64x128xf32, #tpu.memory_space<vmem>>, vector<8x128xf32>,
    %c6_i32 = arith.constant 6 : i32
    %c8_i32_56 = arith.constant 8 : i32
    %217 = arith.muli %c6_i32, %c8_i32_56 : i32
    %218 = tpu.assume_multiple %217, 8 : i32
    %219 = arith.index_cast %218 : i32 to index
    %c0_57 = arith.constant 0 : index
    %220 = vector.load %arg12[%219, %c0_57] : memref<64x512xf32, #tpu.memory_space<vmem>>, vector<8x512xf32>
    %221 = arith.truncf %214 : vector<8x128xf32> to vector<8x128xbf16>
    %cst_58 = arith.constant dense<0.000000e+00> : vector<8x512xf32>
    %222 = tpu.matmul %221, %10, %cst_58 {dimension_numbers = #tpu.dot_dimension_numbers<[1], [0], [0], [1], [0, 0, 1, 1], [], []>} : vector<8x128xbf16>, vector<128x512xbf16>, vector<8x512xf32> -> vector<8x512xf32>
    %223 = arith.addf %220, %222 : vector<8x512xf32>
    %224 = vector.extract_strided_slice %223 {offsets = [0, 0], sizes = [8, 128], strides = [1, 1]} : vector<8x512xf32> to vector<8x128xf32>
    %225 = arith.negf %224 : vector<8x128xf32>
    %226 = math.exp %225 : vector<8x128xf32>
    %cst_59 = arith.constant 1.000000e+00 : f32
    %227 = vector.broadcast %cst_59 : f32 to vector<8x128xf32>
    %228 = arith.addf %227, %226 : vector<8x128xf32>
    %229 = arith.divf %227, %228 : vector<8x128xf32>
    %230 = vector.extract_strided_slice %223 {offsets = [0, 128], sizes = [8, 128], strides = [1, 1]} : vector<8x512xf32> to vector<8x128xf32>
    %231 = arith.negf %230 : vector<8x128xf32>
    %232 = math.exp %231 : vector<8x128xf32>
    %cst_60 = arith.constant 1.000000e+00 : f32
    %233 = vector.broadcast %cst_60 : f32 to vector<8x128xf32>
    %234 = arith.addf %233, %232 : vector<8x128xf32>
    %235 = arith.divf %233, %234 : vector<8x128xf32>
    %236 = vector.extract_strided_slice %223 {offsets = [0, 256], sizes = [8, 128], strides = [1, 1]} : vector<8x512xf32> to vector<8x128xf32>
    %237 = math.tanh %236 : vector<8x128xf32>
    %238 = vector.extract_strided_slice %223 {offsets = [0, 384], sizes = [8, 128], strides = [1, 1]} : vector<8x512xf32> to vector<8x128xf32>
    %239 = arith.negf %238 : vector<8x128xf32>
    %240 = math.exp %239 : vector<8x128xf32>
    %cst_61 = arith.constant 1.000000e+00 : f32
    %241 = vector.broadcast %cst_61 : f32 to vector<8x128xf32>
    %242 = arith.addf %241, %240 : vector<8x128xf32>
    %243 = arith.divf %241, %242 : vector<8x128xf32>
    %244 = arith.mulf %235, %212 : vector<8x128xf32>
    %245 = arith.mulf %229, %237 : vector<8x128xf32>
    %246 = arith.addf %244, %245 : vector<8x128xf32>
    %247 = math.tanh %246 : vector<8x128xf32>
    %248 = arith.mulf %243, %247 : vector<8x128xf32>
    %249 = arith.index_cast %218 : i32 to index
    %c0_62 = arith.constant 0 : index
    %250 = vector.load %arg13[%249, %c0_62] : memref<64x128xf32, #tpu.memory_space<vmem>>, vector<8x128xf32>
    tpu.vector_store %arg13[%249, %c0_62], %248 {strides = array<i32>} : memref<64x128xf32, #tpu.memory_space<vmem>>, vector<8x128xf32>,
    %c7_i32 = arith.constant 7 : i32
    %c8_i32_63 = arith.constant 8 : i32
    %251 = arith.muli %c7_i32, %c8_i32_63 : i32
    %252 = tpu.assume_multiple %251, 8 : i32
    %253 = arith.index_cast %252 : i32 to index
    %c0_64 = arith.constant 0 : index
    %254 = vector.load %arg12[%253, %c0_64] : memref<64x512xf32, #tpu.memory_space<vmem>>, vector<8x512xf32>
    %255 = arith.truncf %248 : vector<8x128xf32> to vector<8x128xbf16>
    %cst_65 = arith.constant dense<0.000000e+00> : vector<8x512xf32>
    %256 = tpu.matmul %255, %10, %cst_65 {dimension_numbers = #tpu.dot_dimension_numbers<[1], [0], [0], [1], [0, 0, 1, 1], [], []>} : vector<8x128xbf16>, vector<128x512xbf16>, vector<8x512xf32> -> vector<8x512xf32>
    %257 = arith.addf %254, %256 : vector<8x512xf32>
    %258 = vector.extract_strided_slice %257 {offsets = [0, 0], sizes = [8, 128], strides = [1, 1]} : vector<8x512xf32> to vector<8x128xf32>
    %259 = arith.negf %258 : vector<8x128xf32>
    %260 = math.exp %259 : vector<8x128xf32>
    %cst_66 = arith.constant 1.000000e+00 : f32
    %261 = vector.broadcast %cst_66 : f32 to vector<8x128xf32>
    %262 = arith.addf %261, %260 : vector<8x128xf32>
    %263 = arith.divf %261, %262 : vector<8x128xf32>
    %264 = vector.extract_strided_slice %257 {offsets = [0, 128], sizes = [8, 128], strides = [1, 1]} : vector<8x512xf32> to vector<8x128xf32>
    %265 = arith.negf %264 : vector<8x128xf32>
    %266 = math.exp %265 : vector<8x128xf32>
    %cst_67 = arith.constant 1.000000e+00 : f32
    %267 = vector.broadcast %cst_67 : f32 to vector<8x128xf32>
    %268 = arith.addf %267, %266 : vector<8x128xf32>
    %269 = arith.divf %267, %268 : vector<8x128xf32>
    %270 = vector.extract_strided_slice %257 {offsets = [0, 256], sizes = [8, 128], strides = [1, 1]} : vector<8x512xf32> to vector<8x128xf32>
    %271 = math.tanh %270 : vector<8x128xf32>
    %272 = vector.extract_strided_slice %257 {offsets = [0, 384], sizes = [8, 128], strides = [1, 1]} : vector<8x512xf32> to vector<8x128xf32>
    %273 = arith.negf %272 : vector<8x128xf32>
    %274 = math.exp %273 : vector<8x128xf32>
    %cst_68 = arith.constant 1.000000e+00 : f32
    %275 = vector.broadcast %cst_68 : f32 to vector<8x128xf32>
    %276 = arith.addf %275, %274 : vector<8x128xf32>
    %277 = arith.divf %275, %276 : vector<8x128xf32>
    %278 = arith.mulf %269, %246 : vector<8x128xf32>
    %279 = arith.mulf %263, %271 : vector<8x128xf32>
    %280 = arith.addf %278, %279 : vector<8x128xf32>
    %281 = math.tanh %280 : vector<8x128xf32>
    %282 = arith.mulf %277, %281 : vector<8x128xf32>
    %283 = arith.index_cast %252 : i32 to index
    %c0_69 = arith.constant 0 : index
    %284 = vector.load %arg13[%283, %c0_69] : memref<64x128xf32, #tpu.memory_space<vmem>>, vector<8x128xf32>
    tpu.vector_store %arg13[%283, %c0_69], %282 {strides = array<i32>} : memref<64x128xf32, #tpu.memory_space<vmem>>, vector<8x128xf32>,
    %c8_i32_70 = arith.constant 8 : i32
    %c0_71 = arith.constant 0 : index
    %c0_72 = arith.constant 0 : index
    %285 = vector.load %arg10[%c0_71, %c0_72] : memref<8x128xf32, #tpu.memory_space<vmem>>, vector<8x128xf32>
    tpu.vector_store %arg10[%c0_71, %c0_72], %282 {strides = array<i32>} : memref<8x128xf32, #tpu.memory_space<vmem>>, vector<8x128xf32>,
    %c0_73 = arith.constant 0 : index
    %c0_74 = arith.constant 0 : index
    %286 = vector.load %arg11[%c0_73, %c0_74] : memref<8x128xf32, #tpu.memory_space<vmem>>, vector<8x128xf32>
    tpu.vector_store %arg11[%c0_73, %c0_74], %280 {strides = array<i32>} : memref<8x128xf32, #tpu.memory_space<vmem>>, vector<8x128xf32>,
    %c0_75 = arith.constant 0 : index
    %c0_76 = arith.constant 0 : index
    %287 = vector.load %arg13[%c0_75, %c0_76] : memref<64x128xf32, #tpu.memory_space<vmem>>, vector<64x128xf32>
    %288 = arith.truncf %287 : vector<64x128xf32> to vector<64x128xbf16>
    %c0_77 = arith.constant 0 : index
    %c0_78 = arith.constant 0 : index
    %289 = vector.load %arg7[%c0_77, %c0_78] : memref<128x128xbf16, #tpu.memory_space<vmem>>, vector<128x128xbf16>
    %cst_79 = arith.constant dense<0.000000e+00> : vector<64x128xf32>
    %290 = tpu.matmul %288, %289, %cst_79 {dimension_numbers = #tpu.dot_dimension_numbers<[1], [0], [0], [1], [0, 0, 1, 1], [], []>} : vector<64x128xbf16>, vector<128x128xbf16>, vector<64x128xf32> -> vector<64x128xf32>
    %c0_80 = arith.constant 0 : index
    %c0_81 = arith.constant 0 : index
    %291 = vector.load %arg8[%c0_80, %c0_81] : memref<1x128xf32, #tpu.memory_space<vmem>>, vector<1x128xf32>
    %292 = vector.broadcast %291 : vector<1x128xf32> to vector<64x128xf32>
    %293 = arith.addf %290, %292 : vector<64x128xf32>
    %c0_82 = arith.constant 0 : index
    %c0_83 = arith.constant 0 : index
    %294 = vector.load %arg9[%c0_82, %c0_83] : memref<64x128xf32, #tpu.memory_space<vmem>>, vector<64x128xf32>
    tpu.vector_store %arg9[%c0_82, %c0_83], %293 {strides = array<i32>} : memref<64x128xf32, #tpu.memory_space<vmem>>, vector<64x128xf32>,
    return
  }
  func.func @transform_0(%arg0: i32) -> (i32, i32) {
    %c0_i32 = arith.constant 0 : i32
    %c0_i32_0 = arith.constant 0 : i32
    return %arg0, %c0_i32 : i32, i32
  }
  func.func @transform_1(%arg0: i32) -> (i32, i32) {
    %c0_i32 = arith.constant 0 : i32
    %c0_i32_0 = arith.constant 0 : i32
    %c0_i32_1 = arith.constant 0 : i32
    return %c0_i32, %c0_i32_0 : i32, i32
  }
  func.func @transform_2(%arg0: i32) -> (i32, i32) {
    %c0_i32 = arith.constant 0 : i32
    %c0_i32_0 = arith.constant 0 : i32
    %c0_i32_1 = arith.constant 0 : i32
    return %c0_i32, %c0_i32_0 : i32, i32
  }
  func.func @transform_3(%arg0: i32) -> (i32, i32) {
    %c0_i32 = arith.constant 0 : i32
    %c0_i32_0 = arith.constant 0 : i32
    %c0_i32_1 = arith.constant 0 : i32
    return %c0_i32, %c0_i32_0 : i32, i32
  }
  func.func @transform_4(%arg0: i32) -> (i32, i32) {
    %c0_i32 = arith.constant 0 : i32
    %c0_i32_0 = arith.constant 0 : i32
    %c0_i32_1 = arith.constant 0 : i32
    return %c0_i32, %c0_i32_0 : i32, i32
  }
  func.func @transform_5(%arg0: i32) -> (i32, i32) {
    %c0_i32 = arith.constant 0 : i32
    %c0_i32_0 = arith.constant 0 : i32
    %c0_i32_1 = arith.constant 0 : i32
    return %c0_i32, %c0_i32_0 : i32, i32
  }
  func.func @transform_6(%arg0: i32) -> (i32, i32) {
    %c0_i32 = arith.constant 0 : i32
    %c0_i32_0 = arith.constant 0 : i32
    %c0_i32_1 = arith.constant 0 : i32
    return %c0_i32, %c0_i32_0 : i32, i32
  }
  func.func @transform_7(%arg0: i32) -> (i32, i32) {
    %c0_i32 = arith.constant 0 : i32
    %c0_i32_0 = arith.constant 0 : i32
    %c0_i32_1 = arith.constant 0 : i32
    return %c0_i32, %c0_i32_0 : i32, i32
  }
  func.func @transform_8(%arg0: i32) -> (i32, i32) {
    %c0_i32 = arith.constant 0 : i32
    %c0_i32_0 = arith.constant 0 : i32
    return %arg0, %c0_i32 : i32, i32
  }
  func.func @transform_9(%arg0: i32) -> (i32, i32) {
    %c0_i32 = arith.constant 0 : i32
    %c0_i32_0 = arith.constant 0 : i32
    %c0_i32_1 = arith.constant 0 : i32
    return %c0_i32, %c0_i32_0 : i32, i32
  }
  func.func @transform_10(%arg0: i32) -> (i32, i32) {
    %c0_i32 = arith.constant 0 : i32
    %c0_i32_0 = arith.constant 0 : i32
    %c0_i32_1 = arith.constant 0 : i32
    return %c0_i32, %c0_i32_0 : i32, i32
  }
}

</mosaic_0001>

<bundles_post_ra>
// kernel: text_model_forward.1
= control target key start
LH: loop header
LB: loop body
LE: loop exit
PB: predicated region body
PF: predicated region fallthrough
CT: control target
= control target key end

     0   :  { %16 = vsyncpa [#allocation5], 0  ;;  %s2960_s0 = inlined_call_operand.vmem [shape: bf16[64,128], index: 0, kind: input, shape index: {}]   ;;  %s2961_s1 = inlined_call_operand.vmem [shape: f32[8,128], index: 1, kind: input, shape index: {}]   ;;  %s2962_s2 = inlined_call_operand.vmem [shape: f32[8,128], index: 2, kind: input, shape index: {}]   ;;  %s2963_s3 = inlined_call_operand.hbm [shape: bf16[128,512], index: 3, kind: input, shape index: {}]   ;;  %s2964_s4 = inlined_call_operand.hbm [shape: bf16[128,512], index: 4, kind: input, shape index: {}]   ;;  %s2965_s5 = inlined_call_operand.vmem [shape: f32[1,512], index: 5, kind: input, shape index: {}]   ;;  %s2966_s6 = inlined_call_operand.vmem [shape: bf16[128,128], index: 6, kind: input, shape index: {}]   ;;  %s2967_s7 = inlined_call_operand.vmem [shape: f32[1,128], index: 7, kind: input, shape index: {}]   ;;  %s2968_s8 = inlined_call_operand.vmem [shape: f32[64,128], index: 8, kind: output, shape index: {0}]   ;;  %s2969_s9 = inlined_call_operand.vmem [shape: f32[8,128], index: 9, kind: output, shape index: {1}]   ;;  %s2970_s10 = inlined_call_operand.vmem [shape: f32[8,128], index: 10, kind: output, shape index: {2}]  }
   0x1   :  { %17 = vsyncpa [#allocation7], 0  ;;  %s2283_s13 = smov [#allocation4]   ;;  %s2235_s17 = scalar_lea.hbm %s2963_s3, 4096 }
   0x2   :  { %s29_s14 = sshll.u32 %s2283_s13, 4  ;;  %p2236_p0 = scmp.ne.s32.totalorder %s2963_s3, %s2235_s17  ;;  %s30_s14 = int_to_ptr.vmem [resolvable:$true] %s29_s14 }
   0x3   :  { %p2239_p1 = scmp.lt.u32.totalorder %s2235_s17, %s2963_s3 }
   0x5   :  { %p2241_p2 = pnand %p2239_p1, %p2236_p0 }
   0x7   :  { %2244 = shalt.err (!%p2241_p2)
}
   0x8   :  { %s2245_s22 = scalar_lea.vmem %s30_s14, 4096  ;;  %p2250_p4 = scmp.lt.s32.totalorder %s30_s14, %s30_s14 }
   0x9   :  { %p2246_p3 = scmp.ne.s32.totalorder %s30_s14, %s2245_s22  ;;  %p2251_p5 = scmp.lt.s32.totalorder %s2245_s22, %s2245_s22 }
   0xb   :  { %p2252_p6 = por %p2251_p5, %p2250_p4 }
   0xd   :  { %p2253_p7 = pnand %p2252_p6, %p2246_p3 }
   0xf   :  { %2256 = shalt.err (!%p2253_p7)
}
  0x10   :  { %s2284_s23 = smov 256   ;;  %s2285_s24 = smov 16  }
  0x11   :  { %35 = dma.hbm_to_vmem [thread:$0]  %s2963_s3, 4096, %s30_s14, [#allocation5], %s2284_s23, %s2284_s23, %s2285_s24  }
  0x12   :  { %s2286_s27 = smov [#allocation6]   ;;  %s2257_s11 = scalar_lea.hbm %s2964_s4, 4096 }
  0x13   :  { %s41_s28 = sshll.u32 %s2286_s27, 4  ;;  %p2258_p8 = scmp.ne.s32.totalorder %s2964_s4, %s2257_s11  ;;  %s42_s28 = int_to_ptr.vmem [resolvable:$true] %s41_s28 }
  0x14   :  { %p2261_p9 = scmp.lt.u32.totalorder %s2257_s11, %s2964_s4 }
  0x16   :  { %p2263_p10 = pnand %p2261_p9, %p2258_p8 }
  0x18   :  { %2266 = shalt.err (!%p2263_p10)
}
  0x19   :  { %s2267_s17 = scalar_lea.vmem %s42_s28, 4096  ;;  %p2272_p12 = scmp.lt.s32.totalorder %s42_s28, %s42_s28 }
  0x1a   :  { %p2268_p11 = scmp.ne.s32.totalorder %s42_s28, %s2267_s17  ;;  %p2273_p13 = scmp.lt.s32.totalorder %s2267_s17, %s2267_s17 }
  0x1c   :  { %p2274_p0 = por %p2273_p13, %p2272_p12 }
  0x1e   :  { %p2275_p1 = pnand %p2274_p0, %p2268_p11 }
  0x20   :  { %2278 = shalt.err (!%p2275_p1)
}
  0x21   :  { %47 = dma.hbm_to_vmem [thread:$0]  %s2964_s4, 4096, %s42_s28, [#allocation7], %s2284_s23, %s2284_s23, %s2285_s24  }
  0x22   :  { %2279 = dma.done.wait [#allocation5], 4096  }
  0x23   :  { %2280 = vsyncadd [#allocation5], 4294963200 }
  0x24   :  { %2281 = dma.done.wait [#allocation7], 4096  }
  0x25   :  { %2282 = vsyncadd [#allocation7], 4294963200  ;;  %v2971_v0 = vmov 0   ;;  %v1967_v1 = vld [vmem:[#allocation4 + $0x4] ss:$16 sps:$4 sm:$0xff]   ;;  %v2022_v41 = vld [vmem:[%s2960_s0 + $0x8] sm:$0xff]  }
  0x26   :  { %347 = vmatprep.mubr.bf16.mxu1 %v2971_v0  ;;  %727 = vmatprep.mubr.bf16.mxu0 %v2971_v0  ;;  %v1969_v2 = vld [vmem:[#allocation4] ss:$16 sps:$4 sm:$0xff]   ;;  %v2369_v3 = vld [vmem:[#allocation6 + $0x4] ss:$16 sps:$4 sm:$0xff]   ;;  %v2018_v33 = vld [vmem:[#allocation4 + $0xc] ss:$16 sps:$4 sm:$0xff]  }
  0x27   :  { %315 = vmatprep.subr.bf16.mxu1 %v1967_v1  ;;  %v2371_v4 = vld [vmem:[#allocation6] ss:$16 sps:$4 sm:$0xff]   ;;  %v1973_v5 = vld [vmem:[#allocation4 + $0x24] ss:$16 sps:$4 sm:$0xff]   ;;  %695 = vmatprep.subr.bf16.mxu0 %v2369_v3  ;;  %v2016_v36 = vld [vmem:[#allocation4 + $0x8] ss:$16 sps:$4 sm:$0xff]  }
  0x28   :  { %316 = vmatpush1.bf16.msra.mxu1 %v1969_v2  ;;  %v1975_v6 = vld [vmem:[#allocation4 + $0x20] ss:$16 sps:$4 sm:$0xff]   ;;  %v2374_v7 = vld [vmem:[#allocation6 + $0x24] ss:$16 sps:$4 sm:$0xff]   ;;  %696 = vmatpush1.bf16.msra.mxu0 %v2371_v4  ;;  %v2021_v38 = vld [vmem:[#allocation4 + $0x2c] ss:$16 sps:$4 sm:$0xff]  }
  0x29   :  { %317 = vmatprep.subr.bf16.mxu1 %v1973_v5  ;;  %v2377_v8 = vld [vmem:[#allocation6 + $0x20] ss:$16 sps:$4 sm:$0xff]   ;;  %697 = vmatprep.subr.bf16.mxu0 %v2374_v7  ;;  %v1979_v9 = vld [vmem:[#allocation4 + $0x44] ss:$16 sps:$4 sm:$0xff]   ;;  %v2019_v39 = vld [vmem:[#allocation4 + $0x28] ss:$16 sps:$4 sm:$0xff]  }
  0x2a   :  { %v1981_v10 = vld [vmem:[#allocation4 + $0x40] ss:$16 sps:$4 sm:$0xff]   ;;  %v2380_v11 = vld [vmem:[#allocation6 + $0x44] ss:$16 sps:$4 sm:$0xff]   ;;  %v2025_v40 = vld [vmem:[#allocation4 + $0x4c] ss:$16 sps:$4 sm:$0xff]  }
  0x2b   :  { %v1985_v12 = vld [vmem:[#allocation4 + $0x64] ss:$16 sps:$4 sm:$0xff]   ;;  %v2383_v13 = vld [vmem:[#allocation6 + $0x40] ss:$16 sps:$4 sm:$0xff]   ;;  %v2023_v42 = vld [vmem:[#allocation4 + $0x48] ss:$16 sps:$4 sm:$0xff]  }
  0x2c   :  { %318 = vmatpush1.bf16.msra.mxu1 %v1975_v6  ;;  %698 = vmatpush1.bf16.msra.mxu0 %v2377_v8  ;;  %v2386_v14 = vld [vmem:[#allocation6 + $0x64] ss:$16 sps:$4 sm:$0xff]   ;;  %v1987_v15 = vld [vmem:[#allocation4 + $0x60] ss:$16 sps:$4 sm:$0xff]   ;;  %v2028_v43 = vld [vmem:[#allocation4 + $0x6c] ss:$16 sps:$4 sm:$0xff]  }
  0x2d   :  { %319 = vmatprep.subr.bf16.mxu1 %v1979_v9  ;;  %699 = vmatprep.subr.bf16.mxu0 %v2380_v11  ;;  %v1991_v16 = vld [vmem:[#allocation4 + $0x84] ss:$16 sps:$4 sm:$0xff]   ;;  %v2389_v17 = vld [vmem:[#allocation6 + $0x60] ss:$16 sps:$4 sm:$0xff]   ;;  %v2026_v44 = vld [vmem:[#allocation4 + $0x68] ss:$16 sps:$4 sm:$0xff]  }
  0x2e   :  { %v2392_v18 = vld [vmem:[#allocation6 + $0x84] ss:$16 sps:$4 sm:$0xff]   ;;  %v1993_v19 = vld [vmem:[#allocation4 + $0x80] ss:$16 sps:$4 sm:$0xff]   ;;  %v2032_v45 = vld [vmem:[#allocation4 + $0x8c] ss:$16 sps:$4 sm:$0xff]  }
  0x2f   :  { %v1997_v20 = vld [vmem:[#allocation4 + $0xa4] ss:$16 sps:$4 sm:$0xff]   ;;  %v2395_v21 = vld [vmem:[#allocation6 + $0x80] ss:$16 sps:$4 sm:$0xff]   ;;  %v2030_v47 = vld [vmem:[#allocation4 + $0x88] ss:$16 sps:$4 sm:$0xff]  }
  0x30   :  { %320 = vmatpush1.bf16.msra.mxu1 %v1981_v10  ;;  %700 = vmatpush1.bf16.msra.mxu0 %v2383_v13  ;;  %v2398_v22 = vld [vmem:[#allocation6 + $0xa4] ss:$16 sps:$4 sm:$0xff]   ;;  %v1999_v23 = vld [vmem:[#allocation4 + $0xa0] ss:$16 sps:$4 sm:$0xff]   ;;  %v2035_v48 = vld [vmem:[#allocation4 + $0xac] ss:$16 sps:$4 sm:$0xff]  }
  0x31   :  { %321 = vmatprep.subr.bf16.mxu1 %v1985_v12  ;;  %701 = vmatprep.subr.bf16.mxu0 %v2386_v14  ;;  %v2003_v24 = vld [vmem:[#allocation4 + $0xc4] ss:$16 sps:$4 sm:$0xff]   ;;  %v2401_v25 = vld [vmem:[#allocation6 + $0xa0] ss:$16 sps:$4 sm:$0xff]   ;;  %v2033_v49 = vld [vmem:[#allocation4 + $0xa8] ss:$16 sps:$4 sm:$0xff]  }
  0x32   :  { %v2404_v26 = vld [vmem:[#allocation6 + $0xc4] ss:$16 sps:$4 sm:$0xff]   ;;  %v2005_v27 = vld [vmem:[#allocation4 + $0xc0] ss:$16 sps:$4 sm:$0xff]   ;;  %v2039_v50 = vld [vmem:[#allocation4 + $0xcc] ss:$16 sps:$4 sm:$0xff]  }
  0x33   :  { %v2009_v28 = vld [vmem:[#allocation4 + $0xe4] ss:$16 sps:$4 sm:$0xff]   ;;  %v2407_v29 = vld [vmem:[#allocation6 + $0xc0] ss:$16 sps:$4 sm:$0xff]   ;;  %v2036_v51 = vld [vmem:[%s2960_s0 + $0x18] sm:$0xff]  }
  0x34   :  { %322 = vmatpush1.bf16.msra.mxu1 %v1987_v15  ;;  %702 = vmatpush1.bf16.msra.mxu0 %v2389_v17  ;;  %v2410_v30 = vld [vmem:[#allocation6 + $0xe4] ss:$16 sps:$4 sm:$0xff]   ;;  %v2011_v31 = vld [vmem:[#allocation4 + $0xe0] ss:$16 sps:$4 sm:$0xff]   ;;  %v2037_v52 = vld [vmem:[#allocation4 + $0xc8] ss:$16 sps:$4 sm:$0xff]   ;;  %v111_v15 = vlaneseq }
  0x35   :  { %323 = vmatprep.subr.bf16.mxu1 %v1991_v16  ;;  %703 = vmatprep.subr.bf16.mxu0 %v2392_v18  ;;  %v2412_v32 = vld [vmem:[#allocation6 + $0xe0] ss:$16 sps:$4 sm:$0xff]   ;;  %v2042_v53 = vld [vmem:[#allocation4 + $0xec] ss:$16 sps:$4 sm:$0xff]   ;;  %v2040_v54 = vld [vmem:[#allocation4 + $0xe8] ss:$16 sps:$4 sm:$0xff]  }
  0x36   :  { %v65_v34 = vld [vmem:[%s2961_s1] sm:$0xff]  ;;  %v2029_v46 = vld [vmem:[%s2960_s0 + $0x10] sm:$0xff]   ;;  %v2456_v55 = vld [vmem:[#allocation6 + $0xc] ss:$16 sps:$4 sm:$0xff]   ;;  %v112_v16 = vshrl.u32 %v111_v15, 7 }
  0x37   :  { %v2422_v35 = vld [vmem:[%s2960_s0] sm:$0xff]   ;;  %v2424_v37 = vpack.c.bf16 %v65_v34, %v65_v34  ;;  %v2460_v56 = vld [vmem:[#allocation6 + $0x8] ss:$16 sps:$4 sm:$0xff]   ;;  %v2463_v57 = vld [vmem:[#allocation6 + $0x2c] ss:$16 sps:$4 sm:$0xff]  }
  0x38   :  { %324 = vmatpush1.bf16.msra.mxu1 %v1993_v19  ;;  %704 = vmatpush1.bf16.msra.mxu0 %v2395_v21  ;;  %v2469_v58 = vld [vmem:[#allocation6 + $0x28] ss:$16 sps:$4 sm:$0xff]   ;;  %v2473_v59 = vld [vmem:[#allocation6 + $0x4c] ss:$16 sps:$4 sm:$0xff]   ;;  %v113_v19 = vsub.s32 0, %v112_v16 }
  0x39   :  { %325 = vmatprep.subr.bf16.mxu1 %v1997_v20  ;;  %705 = vmatprep.subr.bf16.mxu0 %v2398_v22  ;;  %v2476_v60 = vld [vmem:[#allocation6 + $0x48] ss:$16 sps:$4 sm:$0xff]   ;;  %v2479_v61 = vld [vmem:[#allocation6 + $0x6c] ss:$16 sps:$4 sm:$0xff]   ;;  %v69_v20 = vld [vmem:[%s2965_s5] sm:$0xf] }
  0x3a   :  { %v2482_v62 = vld [vmem:[#allocation6 + $0x68] ss:$16 sps:$4 sm:$0xff]   ;;  %v2486_v63 = vld [vmem:[#allocation6 + $0x8c] ss:$16 sps:$4 sm:$0xff]  }
  0x3b   :  { %v2489_v1 = vld [vmem:[#allocation6 + $0x88] ss:$16 sps:$4 sm:$0xff]   ;;  %v2492_v2 = vld [vmem:[#allocation6 + $0xac] ss:$16 sps:$4 sm:$0xff]  }
  0x3c   :  { %326 = vmatpush1.bf16.msra.mxu1 %v1999_v23  ;;  %706 = vmatpush1.bf16.msra.mxu0 %v2401_v25  ;;  %v2495_v5 = vld [vmem:[#allocation6 + $0xa8] ss:$16 sps:$4 sm:$0xff]   ;;  %v2499_v6 = vld [vmem:[#allocation6 + $0xcc] ss:$16 sps:$4 sm:$0xff]   ;;  %v117_v23 = vsub.s32 1, %v112_v16 }
  0x3d   :  { %327 = vmatprep.subr.bf16.mxu1 %v2003_v24  ;;  %707 = vmatprep.subr.bf16.mxu0 %v2404_v26  ;;  %v2502_v9 = vld [vmem:[#allocation6 + $0xc8] ss:$16 sps:$4 sm:$0xff]   ;;  %v2505_v10 = vld [vmem:[#allocation6 + $0xec] ss:$16 sps:$4 sm:$0xff]   ;;  %v114_v24 = vrot.slane %v69_v20, %v113_v19 }
  0x3e   :  { %v2508_v12 = vld [vmem:[#allocation6 + $0xe8] ss:$16 sps:$4 sm:$0xff]  }
  0x40   :  { %328 = vmatpush1.bf16.msra.mxu1 %v2005_v27  ;;  %708 = vmatpush1.bf16.msra.mxu0 %v2407_v29  ;;  %v118_v27 = vrot.slane %v69_v20, %v117_v23 }
  0x41   :  { %329 = vmatprep.subr.bf16.mxu1 %v2009_v28  ;;  %709 = vmatprep.subr.bf16.mxu0 %v2410_v30 }
  0x44   :  { %330 = vmatpush1.bf16.msra.mxu1 %v2011_v31  ;;  %710 = vmatpush1.bf16.msra.mxu0 %v2412_v32 }
  0x45   :  { %388 = vmatprep.subr.bf16.mxu1 %v2018_v33  ;;  %814 = vmatprep.subr.bf16.mxu0 %v2369_v3 }
  0x47   :  { %348 = vmatmul.mubr.bf16.vlgmr.msra.gmra.mrb[0].mxu1 %v2422_v35  ;;  %728 = vmatmul.mubr.bf16.vlgmr.msra.gmra.mrb[0].mxu0 %v2424_v37 }
  0x48   :  { %389 = vmatpush1.bf16.msra.mxu1 %v2016_v36  ;;  %357 = vmatprep.mubr.bf16.mxu1 %v2971_v0 }
  0x49   :  { %390 = vmatprep.subr.bf16.mxu1 %v2021_v38  ;;  %815 = vmatpush1.bf16.msra.mxu0 %v2371_v4 }
  0x4a   :  { %846 = vmatprep.mubr.bf16.mxu0 %v2971_v0  ;;  %816 = vmatprep.subr.bf16.mxu0 %v2374_v7 }
  0x4c   :  { %391 = vmatpush1.bf16.msra.mxu1 %v2019_v39 }
  0x4d   :  { %392 = vmatprep.subr.bf16.mxu1 %v2025_v40  ;;  %817 = vmatpush1.bf16.msra.mxu0 %v2377_v8 }
  0x4e   :  { %818 = vmatprep.subr.bf16.mxu0 %v2380_v11 }
  0x4f   :  { %358 = vmatmul.mubr.bf16.gmra.mrb[4].mxu1 %v2022_v41 }
  0x50   :  { %393 = vmatpush1.bf16.msra.mxu1 %v2023_v42  ;;  %367 = vmatprep.mubr.bf16.mxu1 %v2971_v0 }
  0x51   :  { %394 = vmatprep.subr.bf16.mxu1 %v2028_v43  ;;  %819 = vmatpush1.bf16.msra.mxu0 %v2383_v13 }
  0x52   :  { %820 = vmatprep.subr.bf16.mxu0 %v2386_v14 }
  0x54   :  { %395 = vmatpush1.bf16.msra.mxu1 %v2026_v44 }
  0x55   :  { %396 = vmatprep.subr.bf16.mxu1 %v2032_v45  ;;  %821 = vmatpush1.bf16.msra.mxu0 %v2389_v17 }
  0x56   :  { %822 = vmatprep.subr.bf16.mxu0 %v2392_v18 }
  0x57   :  { %368 = vmatmul.mubr.bf16.gmra.mrb[8].mxu1 %v2029_v46 }
  0x58   :  { %397 = vmatpush1.bf16.msra.mxu1 %v2030_v47  ;;  %377 = vmatprep.mubr.bf16.mxu1 %v2971_v0 }
  0x59   :  { %398 = vmatprep.subr.bf16.mxu1 %v2035_v48  ;;  %823 = vmatpush1.bf16.msra.mxu0 %v2395_v21 }
  0x5a   :  { %824 = vmatprep.subr.bf16.mxu0 %v2398_v22 }
  0x5c   :  { %399 = vmatpush1.bf16.msra.mxu1 %v2033_v49 }
  0x5d   :  { %400 = vmatprep.subr.bf16.mxu1 %v2039_v50  ;;  %825 = vmatpush1.bf16.msra.mxu0 %v2401_v25 }
  0x5e   :  { %826 = vmatprep.subr.bf16.mxu0 %v2404_v26 }
  0x5f   :  { %378 = vmatmul.mubr.bf16.gmra.mrb[12].mxu1 %v2036_v51 }
  0x60   :  { %401 = vmatpush1.bf16.msra.mxu1 %v2037_v52  ;;  %420 = vmatprep.mubr.bf16.mxu1 %v2971_v0 }
  0x61   :  { %402 = vmatprep.subr.bf16.mxu1 %v2042_v53  ;;  %827 = vmatpush1.bf16.msra.mxu0 %v2407_v29 }
  0x62   :  { %828 = vmatprep.subr.bf16.mxu0 %v2410_v30 }
  0x64   :  { %403 = vmatpush1.bf16.msra.mxu1 %v2040_v54 }
  0x65   :  { %736 = vmatprep.subr.bf16.mxu1 %v2456_v55  ;;  %829 = vmatpush1.bf16.msra.mxu0 %v2412_v32 }
  0x66   :  { %934 = vmatprep.subr.bf16.mxu0 %v2369_v3 }
  0x67   :  { %421 = vmatmul.mubr.bf16.vlgmr.msra.gmra.mrb[16].mxu1 %v2422_v35 }
  0x68   :  { %737 = vmatpush1.bf16.msra.mxu1 %v2460_v56  ;;  %430 = vmatprep.mubr.bf16.mxu1 %v2971_v0 }
  0x69   :  { %738 = vmatprep.subr.bf16.mxu1 %v2463_v57 }
  0x6c   :  { %739 = vmatpush1.bf16.msra.mxu1 %v2469_v58 }
  0x6d   :  { %740 = vmatprep.subr.bf16.mxu1 %v2473_v59 }
  0x6f   :  { %431 = vmatmul.mubr.bf16.gmra.mrb[20].mxu1 %v2022_v41 }
  0x70   :  { %741 = vmatpush1.bf16.msra.mxu1 %v2476_v60  ;;  %440 = vmatprep.mubr.bf16.mxu1 %v2971_v0 }
  0x71   :  { %742 = vmatprep.subr.bf16.mxu1 %v2479_v61 }
  0x74   :  { %743 = vmatpush1.bf16.msra.mxu1 %v2482_v62 }
  0x75   :  { %744 = vmatprep.subr.bf16.mxu1 %v2486_v63 }
  0x77   :  { %441 = vmatmul.mubr.bf16.gmra.mrb[24].mxu1 %v2029_v46 }
  0x78   :  { %745 = vmatpush1.bf16.msra.mxu1 %v2489_v1  ;;  %450 = vmatprep.mubr.bf16.mxu1 %v2971_v0 }
  0x79   :  { %746 = vmatprep.subr.bf16.mxu1 %v2492_v2 }
  0x7c   :  { %747 = vmatpush1.bf16.msra.mxu1 %v2495_v5 }
  0x7d   :  { %748 = vmatprep.subr.bf16.mxu1 %v2499_v6 }
  0x7f   :  { %451 = vmatmul.mubr.bf16.gmra.mrb[28].mxu1 %v2036_v51 }
  0x80   :  { %749 = vmatpush1.bf16.msra.mxu1 %v2502_v9  ;;  %768 = vmatprep.mubr.bf16.mxu1 %v2971_v0 }
  0x81   :  { %750 = vmatprep.subr.bf16.mxu1 %v2505_v10 }
  0x84   :  { %751 = vmatpush1.bf16.msra.mxu1 %v2508_v12 }
  0x85   :  { %855 = vmatprep.subr.bf16.mxu1 %v2456_v55 }
  0x87   :  { %769 = vmatmul.mubr.bf16.vlgmr.msra.gmra.mrb[32].mxu1 %v2424_v37 }
  0x88   :  { %856 = vmatpush1.bf16.msra.mxu1 %v2460_v56  ;;  %887 = vmatprep.mubr.bf16.mxu1 %v2971_v0 }
  0x89   :  { %857 = vmatprep.subr.bf16.mxu1 %v2463_v57 }
  0x8c   :  { %858 = vmatpush1.bf16.msra.mxu1 %v2469_v58 }
  0x8d   :  { %859 = vmatprep.subr.bf16.mxu1 %v2473_v59 }
  0x90   :  { %860 = vmatpush1.bf16.msra.mxu1 %v2476_v60 }
  0x91   :  { %861 = vmatprep.subr.bf16.mxu1 %v2479_v61 }
  0x94   :  { %862 = vmatpush1.bf16.msra.mxu1 %v2482_v62 }
  0x95   :  { %863 = vmatprep.subr.bf16.mxu1 %v2486_v63 }
  0x98   :  { %864 = vmatpush1.bf16.msra.mxu1 %v2489_v1 }
  0x99   :  { %865 = vmatprep.subr.bf16.mxu1 %v2492_v2 }
  0x9c   :  { %866 = vmatpush1.bf16.msra.mxu1 %v2495_v5 }
  0x9d   :  { %867 = vmatprep.subr.bf16.mxu1 %v2499_v6 }
  0xa0   :  { %868 = vmatpush1.bf16.msra.mxu1 %v2502_v9 }
  0xa1   :  { %869 = vmatprep.subr.bf16.mxu1 %v2505_v10 }
  0xa4   :  { %870 = vmatpush1.bf16.msra.mxu1 %v2508_v12 }
  0xa5   :  { %975 = vmatprep.subr.bf16.mxu1 %v2456_v55 }
 0x11a   :  { %v349_v28 = vpop.f32.mrb[0].mxu1  ;;  %v729_v36 = vpop.f32.mrb[0].mxu0 }
 0x11b   :  { %v350_v31 = vadd.f32 %v349_v28, %v114_v24  ;;  %v351_v33 = vpop.f32.mrb[1].mxu1  ;;  %v731_v40 = vpop.f32.mrb[1].mxu0 }
 0x11c   :  { %v352_v34 = vadd.f32 %v351_v33, %v118_v27  ;;  %v353_v35 = vpop.f32.mrb[2].mxu1  ;;  %v733_v43 = vpop.f32.mrb[2].mxu0 }
 0x11d   :  { %v2535_v37 = vadd.f32 %v353_v35, %v114_v24  ;;  %v777_v38 = vadd.f32 %v729_v36, %v350_v31  ;;  %v355_v39 = vpop.f32.mrb[3].mxu1  ;;  %v734_v44 = vpop.f32.mrb[3].mxu0 }
 0x11e   :  { %v2537_v41 = vadd.f32 %v355_v39, %v118_v27  ;;  %v778_v42 = vadd.f32 %v731_v40, %v352_v34 }
 0x122   :  { %v359_v45 = vpop.f32.mrb[4].mxu1 }
 0x123   :  { %v2539_v46 = vadd.f32 %v359_v45, %v114_v24  ;;  %v361_v47 = vpop.f32.mrb[5].mxu1 }
 0x124   :  { %v2541_v48 = vadd.f32 %v361_v47, %v118_v27  ;;  %v363_v49 = vpop.f32.mrb[6].mxu1  ;;  %v121_v47 = vsub.s32 2, %v112_v16 }
 0x125   :  { %v2543_v50 = vadd.f32 %v363_v49, %v114_v24  ;;  %v365_v51 = vpop.f32.mrb[7].mxu1  ;;  %v125_v49 = vsub.s32 3, %v112_v16 }
 0x126   :  { %v2545_v52 = vadd.f32 %v365_v51, %v118_v27 }
 0x12a   :  { %v369_v53 = vpop.f32.mrb[8].mxu1 }
 0x12b   :  { %v2547_v54 = vadd.f32 %v369_v53, %v114_v24  ;;  %v371_v15 = vpop.f32.mrb[9].mxu1  ;;  %v122_v53 = vrot.slane %v69_v20, %v121_v47 }
 0x12c   :  { %v2549_v19 = vadd.f32 %v371_v15, %v118_v27  ;;  %v373_v23 = vpop.f32.mrb[10].mxu1 }
 0x12d   :  { %2973 = vst [vmem:[#allocation10_spill] sm:$0xff] %v2547_v54  ;;  %v2551_v28 = vadd.f32 %v373_v23, %v114_v24  ;;  %v375_v31 = vpop.f32.mrb[11].mxu1  ;;  %v126_v23 = vrot.slane %v69_v20, %v125_v49  ;;  %v1893_v20 = vmul.f32 -1.442695, %v777_v38 }
 0x12e   :  { %2974 = vst [vmem:[#allocation11_spill] sm:$0xff] %v2549_v19  ;;  %v2553_v33 = vadd.f32 %v375_v31, %v118_v27 }
 0x12f   :  { %2975 = vst [vmem:[#allocation12_spill] sm:$0xff] %v2551_v28 }
 0x130   :  { %2976 = vst [vmem:[#allocation13_spill] sm:$0xff] %v2553_v33 }
 0x132   :  { %v379_v34 = vpop.f32.mrb[12].mxu1 }
 0x133   :  { %v2555_v35 = vadd.f32 %v379_v34, %v114_v24  ;;  %v381_v36 = vpop.f32.mrb[13].mxu1 }
 0x134   :  { %v2557_v39 = vadd.f32 %v381_v36, %v118_v27  ;;  %v383_v40 = vpop.f32.mrb[14].mxu1 }
 0x135   :  { %2977 = vst [vmem:[#allocation14_spill] sm:$0xff] %v2555_v35  ;;  %v2559_v43 = vadd.f32 %v383_v40, %v114_v24  ;;  %v385_v44 = vpop.f32.mrb[15].mxu1 }
 0x136   :  { %2978 = vst [vmem:[#allocation15_spill] sm:$0xff] %v2557_v39  ;;  %v2561_v45 = vadd.f32 %v385_v44, %v118_v27 }
 0x137   :  { %2979 = vst [vmem:[#allocation16_spill] sm:$0xff] %v2559_v43 }
 0x138   :  { %2980 = vst [vmem:[#allocation17_spill] sm:$0xff] %v2561_v45  ;;  %v1894_v45 = vmul.f32 -1.442695, %v778_v42 }
 0x13a   :  { %v422_v51 = vpop.f32.mrb[16].mxu1  ;;  %2075 = vpow2.f32 %v1894_v45 }
 0x13b   :  { %v424_v15 = vpop.f32.mrb[17].mxu1  ;;  %2077 = vpow2.f32 %v1893_v20 }
 0x13c   :  { %v426_v31 = vpop.f32.mrb[18].mxu1  ;;  %v425_v54 = vadd.f32 %v424_v15, %v126_v23 }
 0x13d   :  { %v2563_v0 = vadd.f32 %v426_v31, %v122_v53  ;;  %v428_v34 = vpop.f32.mrb[19].mxu1 }
 0x13e   :  { %v2565_v35 = vadd.f32 %v428_v34, %v126_v23 }
 0x142   :  { %v432_v36 = vpop.f32.mrb[20].mxu1 }
 0x143   :  { %v2567_v39 = vadd.f32 %v432_v36, %v122_v53  ;;  %v434_v24 = vpop.f32.mrb[21].mxu1 }
 0x144   :  { %v2569_v40 = vadd.f32 %v434_v24, %v126_v23  ;;  %v436_v27 = vpop.f32.mrb[22].mxu1 }
 0x145   :  { %v2571_v44 = vadd.f32 %v436_v27, %v122_v53  ;;  %v438_v16 = vpop.f32.mrb[23].mxu1 }
 0x146   :  { %v2573_v47 = vadd.f32 %v438_v16, %v126_v23  ;;  %v2076_v16 = vpop.eup %2075 }
 0x147   :  { %v2078_v20 = vpop.eup %2077 }
 0x148   :  { %2981 = vst [vmem:[#allocation18_spill] sm:$0xff] %v2573_v47 }
 0x14a   :  { %v442_v49 = vpop.f32.mrb[24].mxu1 }
 0x14b   :  { %v2575_v31 = vadd.f32 %v442_v49, %v122_v53  ;;  %v444_v34 = vpop.f32.mrb[25].mxu1 }
 0x14c   :  { %v2577_v43 = vadd.f32 %v444_v34, %v126_v23  ;;  %v446_v36 = vpop.f32.mrb[26].mxu1 }
 0x14d   :  { %2982 = vst [vmem:[#allocation19_spill] sm:$0xff] %v2575_v31  ;;  %v2579_v33 = vadd.f32 %v446_v36, %v122_v53  ;;  %v448_v24 = vpop.f32.mrb[27].mxu1  ;;  %v784_v36 = vadd.f32 1.0, %v2078_v20 }
 0x14e   :  { %2983 = vst [vmem:[#allocation20_spill] sm:$0xff] %v2577_v43  ;;  %v2581_v28 = vadd.f32 %v448_v24, %v126_v23  ;;  %v790_v43 = vadd.f32 1.0, %v2076_v16 }
 0x14f   :  { %2984 = vst [vmem:[#allocation21_spill] sm:$0xff] %v2579_v33  ;;  %v423_v33 = vadd.f32 %v422_v51, %v122_v53 }
 0x150   :  { %2985 = vst [vmem:[#allocation22_spill] sm:$0xff] %v2581_v28  ;;  %2079 = vrcp.f32 %v790_v43 }
 0x151   :  { %2081 = vrcp.f32 %v784_v36 }
 0x152   :  { %v452_v27 = vpop.f32.mrb[28].mxu1 }
 0x153   :  { %v2583_v19 = vadd.f32 %v452_v27, %v122_v53  ;;  %v454_v42 = vpop.f32.mrb[29].mxu1 }
 0x154   :  { %v2585_v38 = vadd.f32 %v454_v42, %v126_v23  ;;  %v456_v45 = vpop.f32.mrb[30].mxu1 }
 0x155   :  { %2986 = vst [vmem:[#allocation23_spill] sm:$0xff] %v2583_v19  ;;  %v2587_v49 = vadd.f32 %v456_v45, %v122_v53  ;;  %v458_v31 = vpop.f32.mrb[31].mxu1 }
 0x156   :  { %2987 = vst [vmem:[#allocation24_spill] sm:$0xff] %v2585_v38  ;;  %v2589_v34 = vadd.f32 %v458_v31, %v126_v23  ;;  %v67_v31 = vld [vmem:[%s2962_s2] sm:$0xff] }
 0x158   :  { %2988 = vst [vmem:[#allocation25_spill] sm:$0xff] %v2589_v34 }
 0x15a   :  { %v770_v24 = vpop.f32.mrb[32].mxu1  ;;  %v2080_v45 = vpop.eup %2079 }
 0x15b   :  { %v779_v28 = vadd.f32 %v770_v24, %v423_v33  ;;  %v772_v27 = vpop.f32.mrb[33].mxu1  ;;  %v2082_v16 = vpop.eup %2081  ;;  %v800_v51 = vmul.f32 %v2080_v45, %v67_v31 }
 0x15c   :  { %v780_v19 = vadd.f32 %v772_v27, %v425_v54  ;;  %v774_v47 = vpop.f32.mrb[34].mxu1 }
 0x15d   :  { %2083 = vtanh.f32 %v779_v28  ;;  %v775_v42 = vpop.f32.mrb[35].mxu1  ;;  %v2989_v47 = vmov 0  }
 0x15e   :  { %v1895_v38 = vmul.f32 -1.442695, %v780_v19 }
 0x160   :  { %2085 = vpow2.f32 %v1895_v38 }
 0x167   :  { %v2084_v20 = vpop.eup %2083 }
 0x168   :  { %v801_v53 = vmul.f32 %v2084_v20, %v2082_v16 }
 0x16a   :  { %v2086_v15 = vpop.eup %2085  ;;  %v2594_v43 = vadd.f32 %v801_v53, %v800_v51 }
 0x16b   :  { %v797_v33 = vadd.f32 1.0, %v2086_v15 }
 0x16c   :  { %2087 = vtanh.f32 %v2594_v43 }
 0x16d   :  { %2089 = vrcp.f32 %v797_v33 }
 0x176   :  { %v2088_v54 = vpop.eup %2087 }
 0x177   :  { %v2090_v28 = vpop.eup %2089 }
 0x178   :  { %v2597_v19 = vmul.f32 %v2090_v28, %v2088_v54 }
 0x17a   :  { %v813_v23 = vpack.c.bf16 %v2597_v19, %v2597_v19 }
 0x17c   :  { %847 = vmatmul.mubr.bf16.vlgmr.msra.gmra.mrb[4].mxu0 %v813_v23  ;;  %888 = vmatmul.mubr.bf16.vlgmr.msra.gmra.mrb[36].mxu1 %v813_v23 }
 0x17d   :  { %935 = vmatpush1.bf16.msra.mxu0 %v2371_v4  ;;  %976 = vmatpush1.bf16.msra.mxu1 %v2460_v56 }
 0x17e   :  { %936 = vmatprep.subr.bf16.mxu0 %v2374_v7  ;;  %977 = vmatprep.subr.bf16.mxu1 %v2463_v57 }
 0x17f   :  { %966 = vmatprep.mubr.bf16.mxu0 %v2989_v47  ;;  %1007 = vmatprep.mubr.bf16.mxu1 %v2989_v47 }
 0x181   :  { %937 = vmatpush1.bf16.msra.mxu0 %v2377_v8  ;;  %978 = vmatpush1.bf16.msra.mxu1 %v2469_v58 }
 0x182   :  { %938 = vmatprep.subr.bf16.mxu0 %v2380_v11  ;;  %979 = vmatprep.subr.bf16.mxu1 %v2473_v59 }
 0x185   :  { %939 = vmatpush1.bf16.msra.mxu0 %v2383_v13  ;;  %980 = vmatpush1.bf16.msra.mxu1 %v2476_v60 }
 0x186   :  { %940 = vmatprep.subr.bf16.mxu0 %v2386_v14  ;;  %981 = vmatprep.subr.bf16.mxu1 %v2479_v61 }
 0x189   :  { %941 = vmatpush1.bf16.msra.mxu0 %v2389_v17  ;;  %982 = vmatpush1.bf16.msra.mxu1 %v2482_v62 }
 0x18a   :  { %942 = vmatprep.subr.bf16.mxu0 %v2392_v18  ;;  %983 = vmatprep.subr.bf16.mxu1 %v2486_v63 }
 0x18d   :  { %943 = vmatpush1.bf16.msra.mxu0 %v2395_v21  ;;  %984 = vmatpush1.bf16.msra.mxu1 %v2489_v1 }
 0x18e   :  { %944 = vmatprep.subr.bf16.mxu0 %v2398_v22  ;;  %985 = vmatprep.subr.bf16.mxu1 %v2492_v2 }
 0x191   :  { %945 = vmatpush1.bf16.msra.mxu0 %v2401_v25  ;;  %986 = vmatpush1.bf16.msra.mxu1 %v2495_v5 }
 0x192   :  { %946 = vmatprep.subr.bf16.mxu0 %v2404_v26  ;;  %987 = vmatprep.subr.bf16.mxu1 %v2499_v6 }
 0x195   :  { %947 = vmatpush1.bf16.msra.mxu0 %v2407_v29  ;;  %988 = vmatpush1.bf16.msra.mxu1 %v2502_v9 }
 0x196   :  { %948 = vmatprep.subr.bf16.mxu0 %v2410_v30  ;;  %989 = vmatprep.subr.bf16.mxu1 %v2505_v10 }
 0x199   :  { %949 = vmatpush1.bf16.msra.mxu0 %v2412_v32  ;;  %990 = vmatpush1.bf16.msra.mxu1 %v2508_v12 }
 0x19a   :  { %1054 = vmatprep.subr.bf16.mxu0 %v2369_v3  ;;  %1095 = vmatprep.subr.bf16.mxu1 %v2456_v55 }
 0x24f   :  { %v848_v38 = vpop.f32.mrb[4].mxu0  ;;  %v889_v36 = vpop.f32.mrb[36].mxu1 }
 0x250   :  { %v896_v24 = vadd.f32 %v848_v38, %v2535_v37  ;;  %v898_v27 = vadd.f32 %v889_v36, %v2563_v0  ;;  %v850_v42 = vpop.f32.mrb[5].mxu0  ;;  %v891_v45 = vpop.f32.mrb[37].mxu1 }
 0x251   :  { %v897_v31 = vadd.f32 %v850_v42, %v2537_v41  ;;  %v899_v16 = vadd.f32 %v891_v45, %v2565_v35  ;;  %v852_v20 = vpop.f32.mrb[6].mxu0  ;;  %v893_v51 = vpop.f32.mrb[38].mxu1 }
 0x252   :  { %v1896_v53 = vmul.f32 -1.442695, %v896_v24  ;;  %v853_v15 = vpop.f32.mrb[7].mxu0  ;;  %v894_v33 = vpop.f32.mrb[39].mxu1 }
 0x253   :  { %v1897_v54 = vmul.f32 -1.442695, %v897_v31  ;;  %v1898_v28 = vmul.f32 -1.442695, %v899_v16 }
 0x254   :  { %2091 = vpow2.f32 %v1896_v53 }
 0x255   :  { %2093 = vpow2.f32 %v1897_v54 }
 0x256   :  { %2095 = vpow2.f32 %v1898_v28 }
 0x257   :  { %2097 = vtanh.f32 %v898_v27 }
 0x25e   :  { %v2092_v23 = vpop.eup %2091 }
 0x25f   :  { %v2094_v34 = vpop.eup %2093  ;;  %v903_v37 = vadd.f32 1.0, %v2092_v23 }
 0x260   :  { %v909_v0 = vadd.f32 1.0, %v2094_v34  ;;  %v2096_v41 = vpop.eup %2095 }
 0x261   :  { %2099 = vrcp.f32 %v903_v37  ;;  %v2098_v38 = vpop.eup %2097  ;;  %v916_v24 = vadd.f32 1.0, %v2096_v41 }
 0x262   :  { %2101 = vrcp.f32 %v909_v0 }
 0x263   :  { %2103 = vrcp.f32 %v916_v24 }
 0x26b   :  { %v2100_v35 = vpop.eup %2099 }
 0x26c   :  { %v2102_v36 = vpop.eup %2101  ;;  %v920_v42 = vmul.f32 %v2100_v35, %v2098_v38 }
 0x26d   :  { %v919_v45 = vmul.f32 %v2102_v36, %v2594_v43  ;;  %v2104_v16 = vpop.eup %2103 }
 0x26f   :  { %v2640_v31 = vadd.f32 %v920_v42, %v919_v45 }
 0x271   :  { %2105 = vtanh.f32 %v2640_v31 }
 0x27b   :  { %v2106_v20 = vpop.eup %2105 }
 0x27c   :  { %v2643_v51 = vmul.f32 %v2106_v20, %v2104_v16 }
 0x27e   :  { %v933_v34 = vpack.c.bf16 %v2643_v51, %v2643_v51 }
 0x280   :  { %967 = vmatmul.mubr.bf16.vlgmr.msra.gmra.mrb[8].mxu0 %v933_v34  ;;  %1008 = vmatmul.mubr.bf16.vlgmr.msra.gmra.mrb[40].mxu1 %v933_v34 }
 0x281   :  { %1055 = vmatpush1.bf16.msra.mxu0 %v2371_v4  ;;  %1096 = vmatpush1.bf16.msra.mxu1 %v2460_v56 }
 0x282   :  { %1056 = vmatprep.subr.bf16.mxu0 %v2374_v7  ;;  %1097 = vmatprep.subr.bf16.mxu1 %v2463_v57 }
 0x283   :  { %1086 = vmatprep.mubr.bf16.mxu0 %v2989_v47  ;;  %1127 = vmatprep.mubr.bf16.mxu1 %v2989_v47 }
 0x285   :  { %1057 = vmatpush1.bf16.msra.mxu0 %v2377_v8  ;;  %1098 = vmatpush1.bf16.msra.mxu1 %v2469_v58 }
 0x286   :  { %1058 = vmatprep.subr.bf16.mxu0 %v2380_v11  ;;  %1099 = vmatprep.subr.bf16.mxu1 %v2473_v59 }
 0x289   :  { %1059 = vmatpush1.bf16.msra.mxu0 %v2383_v13  ;;  %1100 = vmatpush1.bf16.msra.mxu1 %v2476_v60 }
 0x28a   :  { %1060 = vmatprep.subr.bf16.mxu0 %v2386_v14  ;;  %1101 = vmatprep.subr.bf16.mxu1 %v2479_v61 }
 0x28d   :  { %1061 = vmatpush1.bf16.msra.mxu0 %v2389_v17  ;;  %1102 = vmatpush1.bf16.msra.mxu1 %v2482_v62 }
 0x28e   :  { %1062 = vmatprep.subr.bf16.mxu0 %v2392_v18  ;;  %1103 = vmatprep.subr.bf16.mxu1 %v2486_v63 }
 0x291   :  { %1063 = vmatpush1.bf16.msra.mxu0 %v2395_v21  ;;  %1104 = vmatpush1.bf16.msra.mxu1 %v2489_v1 }
 0x292   :  { %1064 = vmatprep.subr.bf16.mxu0 %v2398_v22  ;;  %1105 = vmatprep.subr.bf16.mxu1 %v2492_v2 }
 0x295   :  { %1065 = vmatpush1.bf16.msra.mxu0 %v2401_v25  ;;  %1106 = vmatpush1.bf16.msra.mxu1 %v2495_v5 }
 0x296   :  { %1066 = vmatprep.subr.bf16.mxu0 %v2404_v26  ;;  %1107 = vmatprep.subr.bf16.mxu1 %v2499_v6 }
 0x299   :  { %1067 = vmatpush1.bf16.msra.mxu0 %v2407_v29  ;;  %1108 = vmatpush1.bf16.msra.mxu1 %v2502_v9 }
 0x29a   :  { %1068 = vmatprep.subr.bf16.mxu0 %v2410_v30  ;;  %1109 = vmatprep.subr.bf16.mxu1 %v2505_v10 }
 0x29d   :  { %1069 = vmatpush1.bf16.msra.mxu0 %v2412_v32  ;;  %1110 = vmatpush1.bf16.msra.mxu1 %v2508_v12 }
 0x29e   :  { %1174 = vmatprep.subr.bf16.mxu0 %v2369_v3  ;;  %1215 = vmatprep.subr.bf16.mxu1 %v2456_v55 }
 0x353   :  { %v968_v4 = vpop.f32.mrb[8].mxu0  ;;  %v1009_v7 = vpop.f32.mrb[40].mxu1 }
 0x354   :  { %v1016_v8 = vadd.f32 %v968_v4, %v2539_v46  ;;  %v1018_v11 = vadd.f32 %v1009_v7, %v2567_v39  ;;  %v970_v13 = vpop.f32.mrb[9].mxu0  ;;  %v1011_v14 = vpop.f32.mrb[41].mxu1  ;;  %v2693_v4 = vld [vmem:[#allocation6] ss:$16 sps:$4 sm:$0xff]  }
 0x355   :  { %v1017_v43 = vadd.f32 %v970_v13, %v2541_v48  ;;  %v1019_v27 = vadd.f32 %v1011_v14, %v2569_v40  ;;  %v972_v53 = vpop.f32.mrb[10].mxu0  ;;  %v1013_v15 = vpop.f32.mrb[42].mxu1  ;;  %v2703_v7 = vld [vmem:[#allocation6 + $0x20] ss:$16 sps:$4 sm:$0xff]   ;;  %v2715_v13 = vld [vmem:[#allocation6 + $0x64] ss:$16 sps:$4 sm:$0xff]  }
 0x356   :  { %v1899_v33 = vmul.f32 -1.442695, %v1016_v8  ;;  %v973_v54 = vpop.f32.mrb[11].mxu0  ;;  %v1014_v28 = vpop.f32.mrb[43].mxu1  ;;  %v2707_v8 = vld [vmem:[#allocation6 + $0x44] ss:$16 sps:$4 sm:$0xff]  }
 0x357   :  { %v1900_v3 = vmul.f32 -1.442695, %v1017_v43  ;;  %v1901_v23 = vmul.f32 -1.442695, %v1019_v27  ;;  %v2990_v14 = vld [vmem:[#allocation18_spill] sm:$0xff] }
 0x358   :  { %2107 = vpow2.f32 %v1899_v33 }
 0x359   :  { %2109 = vpow2.f32 %v1900_v3 }
 0x35a   :  { %2111 = vpow2.f32 %v1901_v23 }
 0x35b   :  { %2113 = vtanh.f32 %v1018_v11  ;;  %v2711_v11 = vld [vmem:[#allocation6 + $0x40] ss:$16 sps:$4 sm:$0xff]  }
 0x362   :  { %v2108_v37 = vpop.eup %2107 }
 0x363   :  { %v2110_v0 = vpop.eup %2109  ;;  %v1023_v46 = vadd.f32 1.0, %v2108_v37 }
 0x364   :  { %v1029_v39 = vadd.f32 1.0, %v2110_v0  ;;  %v2112_v48 = vpop.eup %2111 }
 0x365   :  { %2115 = vrcp.f32 %v1023_v46  ;;  %v2114_v41 = vpop.eup %2113  ;;  %v1036_v36 = vadd.f32 1.0, %v2112_v48 }
 0x366   :  { %2117 = vrcp.f32 %v1029_v39 }
 0x367   :  { %2119 = vrcp.f32 %v1036_v36 }
 0x36f   :  { %v2116_v40 = vpop.eup %2115 }
 0x370   :  { %v2118_v38 = vpop.eup %2117  ;;  %v1040_v35 = vmul.f32 %v2116_v40, %v2114_v41 }
 0x371   :  { %v1039_v42 = vmul.f32 %v2118_v38, %v2640_v31  ;;  %v2120_v45 = vpop.eup %2119  ;;  %v2697_v31 = vld [vmem:[#allocation6 + $0x24] ss:$16 sps:$4 sm:$0xff]  }
 0x373   :  { %v2686_v24 = vadd.f32 %v1040_v35, %v1039_v42 }
 0x375   :  { %2121 = vtanh.f32 %v2686_v24 }
 0x37f   :  { %v2122_v16 = vpop.eup %2121 }
 0x380   :  { %v2689_v20 = vmul.f32 %v2122_v16, %v2120_v45  ;;  %v2771_v45 = vld [vmem:[#allocation6 + $0x84] ss:$16 sps:$4 sm:$0xff]   ;;  %v2775_v16 = vld [vmem:[#allocation6 + $0x80] ss:$16 sps:$4 sm:$0xff]  }
 0x382   :  { %v1053_v34 = vpack.c.bf16 %v2689_v20, %v2689_v20 }
 0x384   :  { %1087 = vmatmul.mubr.bf16.vlgmr.msra.gmra.mrb[12].mxu0 %v1053_v34  ;;  %1128 = vmatmul.mubr.bf16.vlgmr.msra.gmra.mrb[44].mxu1 %v1053_v34  ;;  %v2779_v34 = vld [vmem:[#allocation6 + $0xa4] ss:$16 sps:$4 sm:$0xff]  }
 0x385   :  { %1175 = vmatpush1.bf16.msra.mxu0 %v2693_v4  ;;  %1216 = vmatpush1.bf16.msra.mxu1 %v2460_v56 }
 0x386   :  { %1176 = vmatprep.subr.bf16.mxu0 %v2697_v31  ;;  %1217 = vmatprep.subr.bf16.mxu1 %v2463_v57 }
 0x387   :  { %1206 = vmatprep.mubr.bf16.mxu0 %v2989_v47  ;;  %1247 = vmatprep.mubr.bf16.mxu1 %v2989_v47 }
 0x389   :  { %1177 = vmatpush1.bf16.msra.mxu0 %v2703_v7  ;;  %1218 = vmatpush1.bf16.msra.mxu1 %v2469_v58 }
 0x38a   :  { %1178 = vmatprep.subr.bf16.mxu0 %v2707_v8  ;;  %1219 = vmatprep.subr.bf16.mxu1 %v2473_v59 }
 0x38d   :  { %1179 = vmatpush1.bf16.msra.mxu0 %v2711_v11  ;;  %1220 = vmatpush1.bf16.msra.mxu1 %v2476_v60 }
 0x38e   :  { %1180 = vmatprep.subr.bf16.mxu0 %v2715_v13  ;;  %1221 = vmatprep.subr.bf16.mxu1 %v2479_v61 }
 0x391   :  { %1181 = vmatpush1.bf16.msra.mxu0 %v2389_v17  ;;  %1222 = vmatpush1.bf16.msra.mxu1 %v2482_v62  ;;  %v2737_v17 = vld [vmem:[#allocation6 + $0x4] ss:$16 sps:$4 sm:$0xff]  }
 0x392   :  { %1182 = vmatprep.subr.bf16.mxu0 %v2392_v18  ;;  %1223 = vmatprep.subr.bf16.mxu1 %v2486_v63 }
 0x395   :  { %1183 = vmatpush1.bf16.msra.mxu0 %v2395_v21  ;;  %1224 = vmatpush1.bf16.msra.mxu1 %v2489_v1 }
 0x396   :  { %1184 = vmatprep.subr.bf16.mxu0 %v2398_v22  ;;  %1225 = vmatprep.subr.bf16.mxu1 %v2492_v2 }
 0x399   :  { %1185 = vmatpush1.bf16.msra.mxu0 %v2401_v25  ;;  %1226 = vmatpush1.bf16.msra.mxu1 %v2495_v5 }
 0x39a   :  { %1186 = vmatprep.subr.bf16.mxu0 %v2404_v26  ;;  %1227 = vmatprep.subr.bf16.mxu1 %v2499_v6 }
 0x39d   :  { %1187 = vmatpush1.bf16.msra.mxu0 %v2407_v29  ;;  %1228 = vmatpush1.bf16.msra.mxu1 %v2502_v9 }
 0x39e   :  { %1188 = vmatprep.subr.bf16.mxu0 %v2410_v30  ;;  %1229 = vmatprep.subr.bf16.mxu1 %v2505_v10 }
 0x3a1   :  { %1189 = vmatpush1.bf16.msra.mxu0 %v2412_v32  ;;  %1230 = vmatpush1.bf16.msra.mxu1 %v2508_v12 }
 0x3a2   :  { %1294 = vmatprep.subr.bf16.mxu0 %v2737_v17  ;;  %1335 = vmatprep.subr.bf16.mxu1 %v2456_v55 }
 0x457   :  { %v1088_v18 = vpop.f32.mrb[12].mxu0  ;;  %v1129_v21 = vpop.f32.mrb[44].mxu1 }
 0x458   :  { %v1136_v22 = vadd.f32 %v1088_v18, %v2543_v50  ;;  %v1138_v25 = vadd.f32 %v1129_v21, %v2571_v44  ;;  %v1090_v26 = vpop.f32.mrb[13].mxu0  ;;  %v1131_v29 = vpop.f32.mrb[45].mxu1  ;;  %v2783_v18 = vld [vmem:[#allocation6 + $0xa0] ss:$16 sps:$4 sm:$0xff]   ;;  %v2787_v21 = vld [vmem:[#allocation6 + $0xc4] ss:$16 sps:$4 sm:$0xff]  }
 0x459   :  { %v1137_v30 = vadd.f32 %v1090_v26, %v2545_v52  ;;  %v1139_v32 = vadd.f32 %v1131_v29, %v2990_v14  ;;  %v1092_v43 = vpop.f32.mrb[14].mxu0  ;;  %v1133_v27 = vpop.f32.mrb[46].mxu1  ;;  %v2799_v26 = vld [vmem:[#allocation6 + $0xe0] ss:$16 sps:$4 sm:$0xff]  }
 0x45a   :  { %v1902_v53 = vmul.f32 -1.442695, %v1136_v22  ;;  %v1093_v15 = vpop.f32.mrb[15].mxu0  ;;  %v1134_v33 = vpop.f32.mrb[47].mxu1  ;;  %v2791_v22 = vld [vmem:[#allocation6 + $0xc0] ss:$16 sps:$4 sm:$0xff]  }
 0x45b   :  { %v1903_v54 = vmul.f32 -1.442695, %v1137_v30  ;;  %v1904_v28 = vmul.f32 -1.442695, %v1139_v32  ;;  %v2991_v14 = vld [vmem:[#allocation10_spill] sm:$0xff]  ;;  %v2992_v43 = vld [vmem:[#allocation19_spill] sm:$0xff] }
 0x45c   :  { %2123 = vpow2.f32 %v1902_v53  ;;  %v2993_v33 = vld [vmem:[#allocation11_spill] sm:$0xff] }
 0x45d   :  { %2125 = vpow2.f32 %v1903_v54 }
 0x45e   :  { %2127 = vpow2.f32 %v1904_v28  ;;  %v2994_v28 = vld [vmem:[#allocation20_spill] sm:$0xff] }
 0x45f   :  { %2129 = vtanh.f32 %v1138_v25  ;;  %v2795_v25 = vld [vmem:[#allocation6 + $0xe4] ss:$16 sps:$4 sm:$0xff]  }
 0x466   :  { %v2124_v3 = vpop.eup %2123 }
 0x467   :  { %v2126_v23 = vpop.eup %2125  ;;  %v1143_v50 = vadd.f32 1.0, %v2124_v3 }
 0x468   :  { %v1149_v44 = vadd.f32 1.0, %v2126_v23  ;;  %v2128_v52 = vpop.eup %2127 }
 0x469   :  { %2131 = vrcp.f32 %v1143_v50  ;;  %v2130_v37 = vpop.eup %2129  ;;  %v1156_v48 = vadd.f32 1.0, %v2128_v52 }
 0x46a   :  { %2133 = vrcp.f32 %v1149_v44 }
 0x46b   :  { %2135 = vrcp.f32 %v1156_v48 }
 0x473   :  { %v2132_v0 = vpop.eup %2131 }
 0x474   :  { %v2134_v46 = vpop.eup %2133  ;;  %v1160_v39 = vmul.f32 %v2132_v0, %v2130_v37 }
 0x475   :  { %v1159_v41 = vmul.f32 %v2134_v46, %v2686_v24  ;;  %v2136_v38 = vpop.eup %2135  ;;  %v2767_v24 = vld [vmem:[#allocation6 + $0x60] ss:$16 sps:$4 sm:$0xff]  }
 0x477   :  { %v2746_v40 = vadd.f32 %v1160_v39, %v1159_v41 }
 0x479   :  { %2137 = vtanh.f32 %v2746_v40 }
 0x483   :  { %v2138_v35 = vpop.eup %2137 }
 0x484   :  { %v2749_v36 = vmul.f32 %v2138_v35, %v2136_v38 }
 0x486   :  { %v1173_v42 = vpack.c.bf16 %v2749_v36, %v2749_v36 }
 0x488   :  { %1207 = vmatmul.mubr.bf16.vlgmr.msra.gmra.mrb[16].mxu0 %v1173_v42  ;;  %1248 = vmatmul.mubr.bf16.vlgmr.msra.gmra.mrb[48].mxu1 %v1173_v42 }
 0x489   :  { %1295 = vmatpush1.bf16.msra.mxu0 %v2693_v4  ;;  %1336 = vmatpush1.bf16.msra.mxu1 %v2460_v56 }
 0x48a   :  { %1296 = vmatprep.subr.bf16.mxu0 %v2697_v31  ;;  %1337 = vmatprep.subr.bf16.mxu1 %v2463_v57 }
 0x48b   :  { %1326 = vmatprep.mubr.bf16.mxu0 %v2989_v47  ;;  %1367 = vmatprep.mubr.bf16.mxu1 %v2989_v47 }
 0x48d   :  { %1297 = vmatpush1.bf16.msra.mxu0 %v2703_v7  ;;  %1338 = vmatpush1.bf16.msra.mxu1 %v2469_v58 }
 0x48e   :  { %1298 = vmatprep.subr.bf16.mxu0 %v2707_v8  ;;  %1339 = vmatprep.subr.bf16.mxu1 %v2473_v59 }
 0x491   :  { %1299 = vmatpush1.bf16.msra.mxu0 %v2711_v11  ;;  %1340 = vmatpush1.bf16.msra.mxu1 %v2476_v60 }
 0x492   :  { %1300 = vmatprep.subr.bf16.mxu0 %v2715_v13  ;;  %1341 = vmatprep.subr.bf16.mxu1 %v2479_v61 }
 0x495   :  { %1301 = vmatpush1.bf16.msra.mxu0 %v2767_v24  ;;  %1342 = vmatpush1.bf16.msra.mxu1 %v2482_v62 }
 0x496   :  { %1302 = vmatprep.subr.bf16.mxu0 %v2771_v45  ;;  %1343 = vmatprep.subr.bf16.mxu1 %v2486_v63 }
 0x499   :  { %1303 = vmatpush1.bf16.msra.mxu0 %v2775_v16  ;;  %1344 = vmatpush1.bf16.msra.mxu1 %v2489_v1 }
 0x49a   :  { %1304 = vmatprep.subr.bf16.mxu0 %v2779_v34  ;;  %1345 = vmatprep.subr.bf16.mxu1 %v2492_v2 }
 0x49d   :  { %1305 = vmatpush1.bf16.msra.mxu0 %v2783_v18  ;;  %1346 = vmatpush1.bf16.msra.mxu1 %v2495_v5 }
 0x49e   :  { %1306 = vmatprep.subr.bf16.mxu0 %v2787_v21  ;;  %1347 = vmatprep.subr.bf16.mxu1 %v2499_v6 }
 0x4a1   :  { %1307 = vmatpush1.bf16.msra.mxu0 %v2791_v22  ;;  %1348 = vmatpush1.bf16.msra.mxu1 %v2502_v9 }
 0x4a2   :  { %1308 = vmatprep.subr.bf16.mxu0 %v2795_v25  ;;  %1349 = vmatprep.subr.bf16.mxu1 %v2505_v10 }
 0x4a5   :  { %1309 = vmatpush1.bf16.msra.mxu0 %v2799_v26  ;;  %1350 = vmatpush1.bf16.msra.mxu1 %v2508_v12 }
 0x4a6   :  { %1414 = vmatprep.subr.bf16.mxu0 %v2737_v17  ;;  %1455 = vmatprep.subr.bf16.mxu1 %v2456_v55 }
 0x55b   :  { %v1208_v29 = vpop.f32.mrb[16].mxu0  ;;  %v1249_v30 = vpop.f32.mrb[48].mxu1 }
 0x55c   :  { %v1256_v32 = vadd.f32 %v1208_v29, %v2991_v14  ;;  %v1258_v27 = vadd.f32 %v1249_v30, %v2992_v43  ;;  %v1210_v53 = vpop.f32.mrb[17].mxu0  ;;  %v1251_v15 = vpop.f32.mrb[49].mxu1 }
 0x55d   :  { %v1257_v54 = vadd.f32 %v1210_v53, %v2993_v33  ;;  %v1259_v3 = vadd.f32 %v1251_v15, %v2994_v28  ;;  %v1212_v23 = vpop.f32.mrb[18].mxu0  ;;  %v1253_v50 = vpop.f32.mrb[50].mxu1 }
 0x55e   :  { %v1905_v44 = vmul.f32 -1.442695, %v1256_v32  ;;  %v1213_v52 = vpop.f32.mrb[19].mxu0  ;;  %v1254_v37 = vpop.f32.mrb[51].mxu1 }
 0x55f   :  { %v1906_v0 = vmul.f32 -1.442695, %v1257_v54  ;;  %v1907_v55 = vmul.f32 -1.442695, %v1259_v3 }
 0x560   :  { %2139 = vpow2.f32 %v1905_v44 }
 0x561   :  { %2141 = vpow2.f32 %v1906_v0 }
 0x562   :  { %2143 = vpow2.f32 %v1907_v55 }
 0x563   :  { %2145 = vtanh.f32 %v1258_v27 }
 0x56a   :  { %v2140_v46 = vpop.eup %2139 }
 0x56b   :  { %v2142_v39 = vpop.eup %2141  ;;  %v1263_v48 = vadd.f32 1.0, %v2140_v46 }
 0x56c   :  { %v1269_v41 = vadd.f32 1.0, %v2142_v39  ;;  %v2144_v38 = vpop.eup %2143 }
 0x56d   :  { %2147 = vrcp.f32 %v1263_v48  ;;  %v2146_v35 = vpop.eup %2145  ;;  %v1276_v14 = vadd.f32 1.0, %v2144_v38 }
 0x56e   :  { %2149 = vrcp.f32 %v1269_v41 }
 0x56f   :  { %2151 = vrcp.f32 %v1276_v14  ;;  %v2220_v14 = vld [vmem:[#allocation6 + $0x8] ss:$16 sps:$4 sm:$0xff]  }
 0x577   :  { %v2148_v42 = vpop.eup %2147 }
 0x578   :  { %v2150_v29 = vpop.eup %2149  ;;  %v1280_v30 = vmul.f32 %v2148_v42, %v2146_v35 }
 0x579   :  { %v1279_v32 = vmul.f32 %v2150_v29, %v2746_v40  ;;  %v2152_v53 = vpop.eup %2151 }
 0x57b   :  { %v2810_v43 = vadd.f32 %v1280_v30, %v1279_v32  ;;  %v2221_v32 = vld [vmem:[#allocation6 + $0x2c] ss:$16 sps:$4 sm:$0xff]  }
 0x57d   :  { %2153 = vtanh.f32 %v2810_v43 }
 0x587   :  { %v2154_v15 = vpop.eup %2153 }
 0x588   :  { %v2813_v33 = vmul.f32 %v2154_v15, %v2152_v53  ;;  %v2223_v53 = vld [vmem:[#allocation6 + $0x4c] ss:$16 sps:$4 sm:$0xff]   ;;  %v2226_v15 = vld [vmem:[#allocation6 + $0x68] ss:$16 sps:$4 sm:$0xff]  }
 0x58a   :  { %v1293_v27 = vpack.c.bf16 %v2813_v33, %v2813_v33 }
 0x58c   :  { %1327 = vmatmul.mubr.bf16.vlgmr.msra.gmra.mrb[20].mxu0 %v1293_v27  ;;  %1368 = vmatmul.mubr.bf16.vlgmr.msra.gmra.mrb[52].mxu1 %v1293_v27  ;;  %v2999_v27 = vld [vmem:[#allocation14_spill] sm:$0xff] }
 0x58d   :  { %1415 = vmatpush1.bf16.msra.mxu0 %v2693_v4  ;;  %1456 = vmatpush1.bf16.msra.mxu1 %v2460_v56  ;;  %v2219_v56 = vld [vmem:[#allocation6 + $0xc] ss:$16 sps:$4 sm:$0xff]  }
 0x58e   :  { %1416 = vmatprep.subr.bf16.mxu0 %v2697_v31  ;;  %1457 = vmatprep.subr.bf16.mxu1 %v2463_v57 }
 0x58f   :  { %1446 = vmatprep.mubr.bf16.mxu0 %v2989_v47  ;;  %1487 = vmatprep.mubr.bf16.mxu1 %v2989_v47 }
 0x591   :  { %1417 = vmatpush1.bf16.msra.mxu0 %v2703_v7  ;;  %1458 = vmatpush1.bf16.msra.mxu1 %v2469_v58 }
 0x592   :  { %1418 = vmatprep.subr.bf16.mxu0 %v2707_v8  ;;  %1459 = vmatprep.subr.bf16.mxu1 %v2473_v59  ;;  %v2995_v59 = vld [vmem:[#allocation12_spill] sm:$0xff] }
 0x595   :  { %1419 = vmatpush1.bf16.msra.mxu0 %v2711_v11  ;;  %1460 = vmatpush1.bf16.msra.mxu1 %v2476_v60 }
 0x596   :  { %1420 = vmatprep.subr.bf16.mxu0 %v2715_v13  ;;  %1461 = vmatprep.subr.bf16.mxu1 %v2479_v61  ;;  %v2996_v61 = vld [vmem:[#allocation21_spill] sm:$0xff] }
 0x599   :  { %1421 = vmatpush1.bf16.msra.mxu0 %v2767_v24  ;;  %1462 = vmatpush1.bf16.msra.mxu1 %v2482_v62 }
 0x59a   :  { %1422 = vmatprep.subr.bf16.mxu0 %v2771_v45  ;;  %1463 = vmatprep.subr.bf16.mxu1 %v2486_v63 }
 0x59d   :  { %1423 = vmatpush1.bf16.msra.mxu0 %v2775_v16  ;;  %1464 = vmatpush1.bf16.msra.mxu1 %v2489_v1 }
 0x59e   :  { %1424 = vmatprep.subr.bf16.mxu0 %v2779_v34  ;;  %1465 = vmatprep.subr.bf16.mxu1 %v2492_v2  ;;  %v2997_v2 = vld [vmem:[#allocation13_spill] sm:$0xff] }
 0x5a1   :  { %1425 = vmatpush1.bf16.msra.mxu0 %v2783_v18  ;;  %1466 = vmatpush1.bf16.msra.mxu1 %v2495_v5 }
 0x5a2   :  { %1426 = vmatprep.subr.bf16.mxu0 %v2787_v21  ;;  %1467 = vmatprep.subr.bf16.mxu1 %v2499_v6  ;;  %v2998_v6 = vld [vmem:[#allocation22_spill] sm:$0xff] }
 0x5a5   :  { %1427 = vmatpush1.bf16.msra.mxu0 %v2791_v22  ;;  %1468 = vmatpush1.bf16.msra.mxu1 %v2502_v9 }
 0x5a6   :  { %1428 = vmatprep.subr.bf16.mxu0 %v2795_v25  ;;  %1469 = vmatprep.subr.bf16.mxu1 %v2505_v10 }
 0x5a9   :  { %1429 = vmatpush1.bf16.msra.mxu0 %v2799_v26  ;;  %1470 = vmatpush1.bf16.msra.mxu1 %v2508_v12 }
 0x5aa   :  { %1534 = vmatprep.subr.bf16.mxu0 %v2737_v17  ;;  %1575 = vmatprep.subr.bf16.mxu1 %v2219_v56 }
 0x65f   :  { %v1328_v57 = vpop.f32.mrb[20].mxu0  ;;  %v1369_v58 = vpop.f32.mrb[52].mxu1 }
 0x660   :  { %v1376_v60 = vadd.f32 %v1328_v57, %v2995_v59  ;;  %v1378_v62 = vadd.f32 %v1369_v58, %v2996_v61  ;;  %v1330_v63 = vpop.f32.mrb[21].mxu0  ;;  %v1371_v1 = vpop.f32.mrb[53].mxu1  ;;  %v3002_v61 = vld [vmem:[#allocation24_spill] sm:$0xff] }
 0x661   :  { %v1377_v5 = vadd.f32 %v1330_v63, %v2997_v2  ;;  %v1379_v9 = vadd.f32 %v1371_v1, %v2998_v6  ;;  %v1332_v10 = vpop.f32.mrb[22].mxu0  ;;  %v1373_v40 = vpop.f32.mrb[54].mxu1 }
 0x662   :  { %v1908_v54 = vmul.f32 -1.442695, %v1376_v60  ;;  %v1333_v12 = vpop.f32.mrb[23].mxu0  ;;  %v1374_v28 = vpop.f32.mrb[55].mxu1 }
 0x663   :  { %v1909_v17 = vmul.f32 -1.442695, %v1377_v5  ;;  %v1910_v3 = vmul.f32 -1.442695, %v1379_v9 }
 0x664   :  { %2155 = vpow2.f32 %v1908_v54 }
 0x665   :  { %2157 = vpow2.f32 %v1909_v17 }
 0x666   :  { %2159 = vpow2.f32 %v1910_v3 }
 0x667   :  { %2161 = vtanh.f32 %v1378_v62 }
 0x66e   :  { %v2156_v23 = vpop.eup %2155 }
 0x66f   :  { %v2158_v50 = vpop.eup %2157  ;;  %v1383_v44 = vadd.f32 1.0, %v2156_v23 }
 0x670   :  { %v1389_v52 = vadd.f32 1.0, %v2158_v50  ;;  %v2160_v37 = vpop.eup %2159 }
 0x671   :  { %2163 = vrcp.f32 %v1383_v44  ;;  %v2162_v0 = vpop.eup %2161  ;;  %v1396_v48 = vadd.f32 1.0, %v2160_v37 }
 0x672   :  { %2165 = vrcp.f32 %v1389_v52 }
 0x673   :  { %2167 = vrcp.f32 %v1396_v48  ;;  %v2068_v48 = vld [vmem:[%s2966_s6 + $0x8] sm:$0xff]  }
 0x67b   :  { %v2164_v55 = vpop.eup %2163 }
 0x67c   :  { %v2166_v46 = vpop.eup %2165  ;;  %v1400_v39 = vmul.f32 %v2164_v55, %v2162_v0 }
 0x67d   :  { %v1399_v41 = vmul.f32 %v2166_v46, %v2810_v43  ;;  %v2168_v35 = vpop.eup %2167  ;;  %v2222_v43 = vld [vmem:[#allocation6 + $0x28] ss:$16 sps:$4 sm:$0xff]  }
 0x67f   :  { %v2855_v38 = vadd.f32 %v1400_v39, %v1399_v41  ;;  %v1656_v41 = vpack.c.bf16 %v2643_v51, %v2597_v19  ;;  %v2071_v19 = vld [vmem:[%s2966_s6 + $0x20] sm:$0xff]   ;;  %v2072_v51 = vld [vmem:[%s2966_s6 + $0x28] sm:$0xff]  }
 0x681   :  { %2169 = vtanh.f32 %v2855_v38 }
 0x68b   :  { %v2170_v42 = vpop.eup %2169 }
 0x68c   :  { %v2858_v29 = vmul.f32 %v2170_v42, %v2168_v35  ;;  %v2070_v35 = vld [vmem:[%s2966_s6 + $0x18] sm:$0xff]   ;;  %v2073_v42 = vld [vmem:[%s2966_s6 + $0x30] sm:$0xff]  }
 0x68e   :  { %v1413_v30 = vpack.c.bf16 %v2858_v29, %v2858_v29 }
 0x690   :  { %1447 = vmatmul.mubr.bf16.vlgmr.msra.gmra.mrb[24].mxu0 %v1413_v30  ;;  %1488 = vmatmul.mubr.bf16.vlgmr.msra.gmra.mrb[56].mxu1 %v1413_v30  ;;  %v2074_v30 = vld [vmem:[%s2966_s6 + $0x38] sm:$0xff]  }
 0x691   :  { %1535 = vmatpush1.bf16.msra.mxu0 %v2693_v4  ;;  %1576 = vmatpush1.bf16.msra.mxu1 %v2220_v14  ;;  %v2224_v4 = vld [vmem:[#allocation6 + $0x48] ss:$16 sps:$4 sm:$0xff]   ;;  %v1657_v14 = vpack.c.bf16 %v2749_v36, %v2689_v20 }
 0x692   :  { %1536 = vmatprep.subr.bf16.mxu0 %v2697_v31  ;;  %1577 = vmatprep.subr.bf16.mxu1 %v2221_v32  ;;  %v2225_v31 = vld [vmem:[#allocation6 + $0x6c] ss:$16 sps:$4 sm:$0xff]   ;;  %v1658_v32 = vpack.c.bf16 %v2858_v29, %v2813_v33 }
 0x693   :  { %1566 = vmatprep.mubr.bf16.mxu0 %v2989_v47  ;;  %1607 = vmatprep.mubr.bf16.mxu1 %v2989_v47  ;;  %v2227_v47 = vld [vmem:[#allocation6 + $0x8c] ss:$16 sps:$4 sm:$0xff]  }
 0x695   :  { %1537 = vmatpush1.bf16.msra.mxu0 %v2703_v7  ;;  %1578 = vmatpush1.bf16.msra.mxu1 %v2222_v43  ;;  %v2228_v7 = vld [vmem:[#allocation6 + $0x88] ss:$16 sps:$4 sm:$0xff]  }
 0x696   :  { %1538 = vmatprep.subr.bf16.mxu0 %v2707_v8  ;;  %1579 = vmatprep.subr.bf16.mxu1 %v2223_v53  ;;  %v2229_v8 = vld [vmem:[#allocation6 + $0xac] ss:$16 sps:$4 sm:$0xff]  }
 0x699   :  { %1539 = vmatpush1.bf16.msra.mxu0 %v2711_v11  ;;  %1580 = vmatpush1.bf16.msra.mxu1 %v2224_v4  ;;  %v2230_v11 = vld [vmem:[#allocation6 + $0xa8] ss:$16 sps:$4 sm:$0xff]   ;;  %v3003_v4 = vld [vmem:[#allocation16_spill] sm:$0xff] }
 0x69a   :  { %1540 = vmatprep.subr.bf16.mxu0 %v2715_v13  ;;  %1581 = vmatprep.subr.bf16.mxu1 %v2225_v31  ;;  %v2231_v13 = vld [vmem:[#allocation6 + $0xcc] ss:$16 sps:$4 sm:$0xff]  }
 0x69d   :  { %1541 = vmatpush1.bf16.msra.mxu0 %v2767_v24  ;;  %1582 = vmatpush1.bf16.msra.mxu1 %v2226_v15  ;;  %v2232_v24 = vld [vmem:[#allocation6 + $0xc8] ss:$16 sps:$4 sm:$0xff]  }
 0x69e   :  { %1542 = vmatprep.subr.bf16.mxu0 %v2771_v45  ;;  %1583 = vmatprep.subr.bf16.mxu1 %v2227_v47  ;;  %v2233_v45 = vld [vmem:[#allocation6 + $0xec] ss:$16 sps:$4 sm:$0xff]  }
 0x6a1   :  { %1543 = vmatpush1.bf16.msra.mxu0 %v2775_v16  ;;  %1584 = vmatpush1.bf16.msra.mxu1 %v2228_v7  ;;  %v2234_v16 = vld [vmem:[#allocation6 + $0xe8] ss:$16 sps:$4 sm:$0xff]  }
 0x6a2   :  { %1544 = vmatprep.subr.bf16.mxu0 %v2779_v34  ;;  %1585 = vmatprep.subr.bf16.mxu1 %v2229_v8  ;;  %v2067_v34 = vld [vmem:[%s2966_s6] sm:$0xff]   ;;  %v3004_v8 = vld [vmem:[#allocation17_spill] sm:$0xff] }
 0x6a5   :  { %1545 = vmatpush1.bf16.msra.mxu0 %v2783_v18  ;;  %1586 = vmatpush1.bf16.msra.mxu1 %v2230_v11 }
 0x6a6   :  { %1546 = vmatprep.subr.bf16.mxu0 %v2787_v21  ;;  %1587 = vmatprep.subr.bf16.mxu1 %v2231_v13  ;;  %v3005_v13 = vld [vmem:[#allocation25_spill] sm:$0xff] }
 0x6a9   :  { %1547 = vmatpush1.bf16.msra.mxu0 %v2791_v22  ;;  %1588 = vmatpush1.bf16.msra.mxu1 %v2232_v24  ;;  %v3000_v22 = vld [vmem:[#allocation23_spill] sm:$0xff] }
 0x6aa   :  { %1548 = vmatprep.subr.bf16.mxu0 %v2795_v25  ;;  %1589 = vmatprep.subr.bf16.mxu1 %v2233_v45  ;;  %v3001_v25 = vld [vmem:[#allocation15_spill] sm:$0xff] }
 0x6ad   :  { %1549 = vmatpush1.bf16.msra.mxu0 %v2799_v26  ;;  %1590 = vmatpush1.bf16.msra.mxu1 %v2234_v16 }
 0x6ae   :  { %1938 = vmatprep.subr.bf16.mxu0 %v2067_v34 }
 0x763   :  { %v1448_v18 = vpop.f32.mrb[24].mxu0  ;;  %v1489_v21 = vpop.f32.mrb[56].mxu1 }
 0x764   :  { %v1496_v56 = vadd.f32 %v1448_v18, %v2999_v27  ;;  %v1498_v57 = vadd.f32 %v1489_v21, %v3000_v22  ;;  %v1450_v58 = vpop.f32.mrb[25].mxu0  ;;  %v1491_v59 = vpop.f32.mrb[57].mxu1 }
 0x765   :  { %v1497_v60 = vadd.f32 %v1450_v58, %v3001_v25  ;;  %v1499_v62 = vadd.f32 %v1491_v59, %v3002_v61  ;;  %v1452_v26 = vpop.f32.mrb[26].mxu0  ;;  %v1493_v63 = vpop.f32.mrb[58].mxu1  ;;  %v1917_v61 = vld [vmem:[%s2967_s7] ss:$0 sm:$0xff] }
 0x766   :  { %v1911_v1 = vmul.f32 -1.442695, %v1496_v56  ;;  %v1453_v2 = vpop.f32.mrb[27].mxu0  ;;  %v1494_v5 = vpop.f32.mrb[59].mxu1 }
 0x767   :  { %v1912_v6 = vmul.f32 -1.442695, %v1497_v60  ;;  %v1913_v9 = vmul.f32 -1.442695, %v1499_v62 }
 0x768   :  { %2171 = vpow2.f32 %v1911_v1 }
 0x769   :  { %2173 = vpow2.f32 %v1912_v6 }
 0x76a   :  { %2175 = vpow2.f32 %v1913_v9 }
 0x76b   :  { %2177 = vtanh.f32 %v1498_v57 }
 0x772   :  { %v2172_v10 = vpop.eup %2171 }
 0x773   :  { %v2174_v40 = vpop.eup %2173  ;;  %v1503_v54 = vadd.f32 1.0, %v2172_v10 }
 0x774   :  { %v1509_v12 = vadd.f32 1.0, %v2174_v40  ;;  %v2176_v28 = vpop.eup %2175 }
 0x775   :  { %2179 = vrcp.f32 %v1503_v54  ;;  %v2178_v17 = vpop.eup %2177  ;;  %v1516_v44 = vadd.f32 1.0, %v2176_v28 }
 0x776   :  { %2181 = vrcp.f32 %v1509_v12 }
 0x777   :  { %2183 = vrcp.f32 %v1516_v44 }
 0x77f   :  { %v2180_v3 = vpop.eup %2179 }
 0x780   :  { %v2182_v23 = vpop.eup %2181  ;;  %v1520_v50 = vmul.f32 %v2180_v3, %v2178_v17 }
 0x781   :  { %v1519_v52 = vmul.f32 %v2182_v23, %v2855_v38  ;;  %v2184_v0 = vpop.eup %2183  ;;  %v2069_v38 = vld [vmem:[%s2966_s6 + $0x10] sm:$0xff]  }
 0x783   :  { %v2887_v37 = vadd.f32 %v1520_v50, %v1519_v52 }
 0x785   :  { %2185 = vtanh.f32 %v2887_v37 }
 0x78f   :  { %v2186_v55 = vpop.eup %2185 }
 0x790   :  { %v2890_v46 = vmul.f32 %v2186_v55, %v2184_v0 }
 0x792   :  { %v1533_v39 = vpack.c.bf16 %v2890_v46, %v2890_v46 }
 0x794   :  { %1567 = vmatmul.mubr.bf16.vlgmr.msra.gmra.mrb[28].mxu0 %v1533_v39  ;;  %1608 = vmatmul.mubr.bf16.vlgmr.msra.gmra.mrb[60].mxu1 %v1533_v39 }
 0x795   :  { %1939 = vmatpush3.bf16.msra.mxu0 %v2067_v34  ;;  %1954 = vmatprep.mubr.bf16.mxu0 %v1656_v41 }
 0x796   :  { %1940 = vmatprep.subr.bf16.mxu0 %v2068_v48 }
 0x799   :  { %1941 = vmatpush3.bf16.msra.mxu0 %v2068_v48 }
 0x79a   :  { %1942 = vmatprep.subr.bf16.mxu0 %v2069_v38 }
 0x79d   :  { %1943 = vmatpush3.bf16.msra.mxu0 %v2069_v38 }
 0x79e   :  { %1944 = vmatprep.subr.bf16.mxu0 %v2070_v35 }
 0x7a1   :  { %1945 = vmatpush3.bf16.msra.mxu0 %v2070_v35 }
 0x7a2   :  { %1946 = vmatprep.subr.bf16.mxu0 %v2071_v19 }
 0x7a5   :  { %1947 = vmatpush3.bf16.msra.mxu0 %v2071_v19 }
 0x7a6   :  { %1948 = vmatprep.subr.bf16.mxu0 %v2072_v51 }
 0x7a9   :  { %1949 = vmatpush3.bf16.msra.mxu0 %v2072_v51 }
 0x7aa   :  { %1950 = vmatprep.subr.bf16.mxu0 %v2073_v42 }
 0x7ad   :  { %1951 = vmatpush3.bf16.msra.mxu0 %v2073_v42 }
 0x7ae   :  { %1952 = vmatprep.subr.bf16.mxu0 %v2074_v30 }
 0x7b1   :  { %1953 = vmatpush3.bf16.msra.mxu0 %v2074_v30 }
 0x7b4   :  { %1955 = vmatmul.mubr.bf16.vlgmr.msra.gmra.mrb[32].mxu0 %v1657_v14 }
 0x7b5   :  { %1958 = vmatprep.mubr.bf16.mxu0 %v1658_v32 }
 0x867   :  { %v1568_v43 = vpop.f32.mrb[28].mxu0  ;;  %v1609_v53 = vpop.f32.mrb[60].mxu1 }
 0x868   :  { %v1616_v31 = vadd.f32 %v1568_v43, %v3003_v4  ;;  %v1618_v15 = vadd.f32 %v1609_v53, %v2587_v49  ;;  %v1570_v47 = vpop.f32.mrb[29].mxu0  ;;  %v1611_v7 = vpop.f32.mrb[61].mxu1 }
 0x869   :  { %v1617_v11 = vadd.f32 %v1570_v47, %v3004_v8  ;;  %v1619_v24 = vadd.f32 %v1611_v7, %v3005_v13  ;;  %v1572_v45 = vpop.f32.mrb[30].mxu0  ;;  %v1613_v16 = vpop.f32.mrb[62].mxu1 }
 0x86a   :  { %v1914_v20 = vmul.f32 -1.442695, %v1616_v31  ;;  %v1573_v36 = vpop.f32.mrb[31].mxu0  ;;  %v1614_v34 = vpop.f32.mrb[63].mxu1 }
 0x86b   :  { %v1915_v33 = vmul.f32 -1.442695, %v1617_v11  ;;  %v1916_v29 = vmul.f32 -1.442695, %v1619_v24 }
 0x86c   :  { %2187 = vpow2.f32 %v1914_v20 }
 0x86d   :  { %2189 = vpow2.f32 %v1915_v33 }
 0x86e   :  { %2191 = vpow2.f32 %v1916_v29 }
 0x86f   :  { %2193 = vtanh.f32 %v1618_v15 }
 0x876   :  { %v2188_v18 = vpop.eup %2187 }
 0x877   :  { %v2190_v21 = vpop.eup %2189  ;;  %v1623_v27 = vadd.f32 1.0, %v2188_v18 }
 0x878   :  { %v1629_v49 = vadd.f32 1.0, %v2190_v21  ;;  %v2192_v56 = vpop.eup %2191 }
 0x879   :  { %2195 = vrcp.f32 %v1623_v27  ;;  %v2194_v22 = vpop.eup %2193  ;;  %v1636_v25 = vadd.f32 1.0, %v2192_v56 }
 0x87a   :  { %2197 = vrcp.f32 %v1629_v49 }
 0x87b   :  { %2199 = vrcp.f32 %v1636_v25 }
 0x883   :  { %v2196_v57 = vpop.eup %2195 }
 0x884   :  { %v2198_v58 = vpop.eup %2197  ;;  %v1640_v59 = vmul.f32 %v2196_v57, %v2194_v22 }
 0x885   :  { %v1639_v60 = vmul.f32 %v2198_v58, %v2887_v37  ;;  %v2200_v40 = vpop.eup %2199 }
 0x887   :  { %v1641_v62 = vadd.f32 %v1640_v59, %v1639_v60  ;;  %v1956_v26 = vpop.f32.mrb[32].mxu0 }
 0x888   :  { %v1774_v63 = vadd.f32 %v1956_v26, %v1917_v61  ;;  %v1765_v1 = vpop.f32.mrb[33].mxu0 }
 0x889   :  { %1647 = vst [vmem:[%s2970_s10] sm:$0xff] %v1641_v62  ;;  %v1766_v2 = vadd.f32 %v1917_v61, %v1765_v1  ;;  %v1957_v5 = vpop.f32.mrb[34].mxu0  ;;  %2201 = vtanh.f32 %v1641_v62 }
 0x88a   :  { %1798 = vst [vmem:[%s2968_s8 + $0x10] sm:$0xff] %v1774_v63  ;;  %v1777_v6 = vadd.f32 %v1957_v5, %v1917_v61  ;;  %v1768_v9 = vpop.f32.mrb[35].mxu0 }
 0x88b   :  { %1796 = vst [vmem:[%s2968_s8] sm:$0xff] %v1766_v2  ;;  %v1769_v10 = vadd.f32 %v1917_v61, %v1768_v9 }
 0x88c   :  { %1799 = vst [vmem:[%s2968_s8 + $0x18] sm:$0xff] %v1777_v6 }
 0x88d   :  { %1797 = vst [vmem:[%s2968_s8 + $0x8] sm:$0xff] %v1769_v10 }
 0x893   :  { %v2202_v54 = vpop.eup %2201 }
 0x894   :  { %v1643_v12 = vmul.f32 %v2202_v54, %v2200_v40 }
 0x896   :  { %1646 = vst [vmem:[%s2969_s9] sm:$0xff] %v1643_v12  ;;  %v1659_v28 = vpack.c.bf16 %v1643_v12, %v2890_v46 }
 0x898   :  { %1959 = vmatmul.mubr.bf16.gmra.mrb[36].mxu0 %v1659_v28 }
 0x96b   :  { %v1960_v17 = vpop.f32.mrb[36].mxu0 }
 0x96c   :  { %v1790_v3 = vadd.f32 %v1960_v17, %v1917_v61  ;;  %v1781_v23 = vpop.f32.mrb[37].mxu0 }
 0x96d   :  { %v1782_v50 = vadd.f32 %v1917_v61, %v1781_v23  ;;  %v1961_v44 = vpop.f32.mrb[38].mxu0 }
 0x96e   :  { %1802 = vst [vmem:[%s2968_s8 + $0x30] sm:$0xff] %v1790_v3  ;;  %v1793_v52 = vadd.f32 %v1961_v44, %v1917_v61  ;;  %v1784_v37 = vpop.f32.mrb[39].mxu0 }
 0x96f   :  { %1800 = vst [vmem:[%s2968_s8 + $0x20] sm:$0xff] %v1782_v50  ;;  %v1785_v0 = vadd.f32 %v1917_v61, %v1784_v37 }
 0x970   :  { %1803 = vst [vmem:[%s2968_s8 + $0x38] sm:$0xff] %v1793_v52 }
 0x971   :  { %1801 = vst [vmem:[%s2968_s8 + $0x28] sm:$0xff] %v1785_v0 }
 0x972   :  { %1816 = vsyncpa [#allocation5], 1 }
 0x973   :  { %1817 = vsyncpa [#allocation7], 1 }

</bundles_post_ra>
